<compile_context>
chip_gen: v7x
topology: tpu7x:2x2x1
jax: 0.10.0
libtpu: 0.0.40
codegen_flags: <defaults>
</compile_context>

<pallas_src>
import functools

import jax
import jax.numpy as jnp
from jax.experimental import pallas as pl
from jax.experimental.pallas import tpu as pltpu


# ------------------------------ fused kernel -------------------------------- #

def _tmc_fused_kernel(*refs, B, K, pad, n):
    """Whole 2-block TMC forward in a single kernel invocation.

    refs layout (all in VMEM):
      [0]                      inter-cue input  (B, T, sum(features))
      [1 : 1+n]                intra-cue inputs (B, T, f_i)
      [1+n : 1+n+2(n+2)]       block-1 params: (w, b) pairs for intra*n, pw, inter
      [.. : .. + 2(n+2)]       block-2 params: same layout
      next 1+n                 outputs: inter (B*L2, OC), intra_i (B*L2, OC//n)
      last 2                   scratch: patches (rows, max K*Cin), act (rows, 2*OC)
    """
    f32 = jnp.float32
    num_x = 1 + n
    num_p = 2 * (n + 2)
    x_inter_ref = refs[0]
    x_intra_refs = refs[1:num_x]
    p1_refs = refs[num_x:num_x + num_p]
    p2_refs = refs[num_x + num_p:num_x + 2 * num_p]
    base = num_x + 2 * num_p
    out_inter_ref = refs[base]
    out_intra_refs = refs[base + 1:base + 1 + n]
    patches_ref = refs[base + 1 + n]
    act_ref = refs[base + 2 + n]

    def parse(prefs):
        pairs = [(prefs[2 * i], prefs[2 * i + 1]) for i in range(n + 2)]
        return pairs[:n], pairs[n], pairs[n + 1]          # intra list, pw, inter

    def conv_same(xb_list, w_ref, b_ref, relu):
        """'same'-padded Conv1d as ONE im2col matmul over all batches.

        xb_list: per-batch (Tc, Cin) values. Padding is done by zero-filling
        the VMEM patch scratch and writing only the valid taps, so the input
        is never padded or copied in HBM.
        """
        Tc, Cin = xb_list[0].shape
        T_out = Tc + 2 * pad - K + 1
        W = K * Cin
        R = B * T_out
        assert w_ref.shape[0] == W, (w_ref.shape, K, Cin)
        patches_ref[0:R, 0:W] = jnp.zeros((R, W), f32)
        for b, xb in enumerate(xb_list):
            r0 = b * T_out
            for k in range(K):                            # K static -> unrolled stores
                t_lo = max(0, pad - k)
                t_hi = min(T_out, Tc + pad - k)
                if t_lo < t_hi:
                    patches_ref[r0 + t_lo:r0 + t_hi, k * Cin:(k + 1) * Cin] = (
                        xb[t_lo + k - pad:t_hi + k - pad, :])
        y = jnp.dot(patches_ref[0:R, 0:W], w_ref[...],
                    preferred_element_type=f32) + b_ref[...]
        if relu:
            y = jnp.maximum(y, 0.0)
        return y                                          # (B*T_out, Cout)

    def pool2(x, t_len):
        """MaxPool1d(2,2) over batch-folded rows via 0/1 selection matmuls."""
        assert t_len % 2 == 0, "fused pool assumes an even time length"
        R, _ = x.shape
        RL = R // 2
        q = jax.lax.broadcasted_iota(jnp.int32, (RL, R), 0)
        c = jax.lax.broadcasted_iota(jnp.int32, (RL, R), 1)
        s_even = (c == 2 * q).astype(f32)
        s_odd = (c == 2 * q + 1).astype(f32)
        return jnp.maximum(jnp.dot(s_even, x, preferred_element_type=f32),
                           jnp.dot(s_odd, x, preferred_element_type=f32))

    def tmc_block(inter_blist, intra_blists, prefs):
        intra_p, pw_p, inter_p = parse(prefs)
        Tc = inter_blist[0].shape[0]
        T_out = Tc + 2 * pad - K + 1
        R = B * T_out
        c_pw = pw_p[0].shape[1]
        c_inter = inter_p[0].shape[1]
        c_intra = [w.shape[1] for w, _ in intra_p]
        half = c_pw + c_inter
        width = half + sum(c_intra)

        # intra-cue convs (+ fused ReLU) -> lanes [half, width) of the act slab
        off = half
        for (w_ref, b_ref), xb_list in zip(intra_p, intra_blists):
            ci = w_ref.shape[1]
            act_ref[0:R, off:off + ci] = conv_same(xb_list, w_ref, b_ref, relu=True)
            off += ci
        # pointwise conv on the already-concatenated intra slab (K=1 conv = matmul)
        fl = act_ref[0:R, half:width]
        pw = jnp.dot(fl, pw_p[0][...], preferred_element_type=f32) + pw_p[1][...]
        act_ref[0:R, 0:c_pw] = pw
        # inter-cue conv
        act_ref[0:R, c_pw:half] = conv_same(inter_blist, inter_p[0], inter_p[1],
                                            relu=False)
        # relu(cat(pw, inter)) fused with the pool; ReLU is a no-op on the intra
        # lanes (already >= 0), so one pooled slab covers everything.
        big = jnp.maximum(act_ref[0:R, 0:width], 0.0)
        pooled = pool2(big, T_out)                        # (B*T_out//2, width)
        out_inter = pooled[:, 0:half]
        outs_intra, off = [], half
        for ci in c_intra:
            outs_intra.append(pooled[:, off:off + ci])
            off += ci
        return out_inter, outs_intra, T_out // 2

    # ---- block 1: inputs straight from the kernel refs ---------------------- #
    x_inter_b = [x_inter_ref[b] for b in range(B)]
    x_intra_b = [[xr[b] for b in range(B)] for xr in x_intra_refs]
    o1, f1, L1 = tmc_block(x_inter_b, x_intra_b, p1_refs)

    # ---- block 2: inputs are block-1 pooled values (never leave VMEM) ------- #
    o1_b = [o1[b * L1:(b + 1) * L1, :] for b in range(B)]
    f1_b = [[fi[b * L1:(b + 1) * L1, :] for b in range(B)] for fi in f1]
    o2, f2, _ = tmc_block(o1_b, f1_b, p2_refs)

    out_inter_ref[...] = o2.astype(out_inter_ref.dtype)
    for oref, val in zip(out_intra_refs, f2):
        oref[...] = val.astype(oref.dtype)


# --------------------------------- wrapper ----------------------------------- #

def _flatten_block_params(p):
    """(K, Cin, Cout)/(Cout,) params -> [(K*Cin, Cout), (1, Cout), ...] flat list."""
    flat = []
    for w, b in list(p["intra"]) + [p["pw"], p["inter"]]:
        k, cin, cout = w.shape
        flat.append(w.reshape(k * cin, cout))
        flat.append(b.reshape(1, cout))
    return flat


@functools.partial(jax.jit, static_argnames=("kernel_size", "padding"))
def tmc_forward(params1, params2, x1, x2, *, kernel_size=5, padding=2):
    """Fused TMC forward.  x1: (B, T, sum(features)); x2: list of (B, T, f_i)."""
    x2 = tuple(x2)
    B, T, _ = x1.shape
    n = len(x2)
    K, pad = kernel_size, padding

    T1 = T + 2 * pad - K + 1          # block-1 conv length
    L1 = T1 // 2                      # after pool 1
    T2 = L1 + 2 * pad - K + 1         # block-2 conv length
    L2 = T2 // 2                      # after pool 2

    flat1 = _flatten_block_params(params1)
    flat2 = _flatten_block_params(params2)

    # output channel counts (from block-2 params)
    c_inter_out = params2["pw"][0].shape[2] + params2["inter"][0].shape[2]
    c_intra_out = [w.shape[2] for w, _ in params2["intra"]]

    # scratch sizing
    k_convs = (list(params1["intra"]) + [params1["inter"]]
               + list(params2["intra"]) + [params2["inter"]])
    patch_w = max(w.shape[0] * w.shape[1] for w, _ in k_convs)

    def _block_width(p):
        return (p["pw"][0].shape[2] + p["inter"][0].shape[2]
                + sum(w.shape[2] for w, _ in p["intra"]))
    act_w = max(_block_width(params1), _block_width(params2))
    patch_rows = B * max(T1, T2)

    out_shape = tuple(
        [jax.ShapeDtypeStruct((B * L2, c_inter_out), x1.dtype)]
        + [jax.ShapeDtypeStruct((B * L2, c), x1.dtype) for c in c_intra_out])

    kern = functools.partial(_tmc_fused_kernel, B=B, K=K, pad=pad, n=n)
    outs = pl.pallas_call(
        kern,
        out_shape=out_shape,
        scratch_shapes=[
            pltpu.VMEM((patch_rows, patch_w), jnp.float32),   # im2col patches
            pltpu.VMEM((B * T1, act_w), jnp.float32),         # lane-concat act slab
        ],
    )(x1, *x2, *flat1, *flat2)

    o2 = outs[0].reshape(B, L2, c_inter_out)
    f2 = [o.reshape(B, L2, c) for o, c in zip(outs[1:], c_intra_out)]
    return o2, f2


# ------------------------------- parameters ---------------------------------- #

def init_conv_params(key, cin, cout, k):
    kw, kb = jax.random.split(key)
    scale = 1.0 / float(cin * k) ** 0.5          # mimic torch Conv1d init bound
    w = jax.random.uniform(kw, (k, cin, cout), jnp.float32, -scale, scale)
    b = jax.random.uniform(kb, (cout,), jnp.float32, -scale, scale)
    return w, b


def init_tmc_block_params(key, out_channels, features, kernel_size):
    n = len(features)
    keys = jax.random.split(key, n + 2)
    return {
        "intra": [init_conv_params(keys[i], features[i], out_channels // n,
                                   kernel_size) for i in range(n)],
        "pw": init_conv_params(keys[n], out_channels, out_channels // 2, 1),
        "inter": init_conv_params(keys[n + 1], sum(features),
                                  out_channels // 2, kernel_size),
    }


# --------------------------- pure-JAX reference ------------------------------- #

def _ref_conv1d(x, w, b, pad):
    y = jax.lax.conv_general_dilated(
        x, w, window_strides=(1,), padding=[(pad, pad)],
        dimension_numbers=("NWC", "WIO", "NWC"))
    return y + b[None, None, :]


def _ref_pool2(x):
    B, T, C = x.shape
    L = T // 2
    return x[:, :2 * L, :].reshape(B, L, 2, C).max(axis=2)


def _ref_tmc_block(p, inter_in, intra_ins, pad):
    outs = [jax.nn.relu(_ref_conv1d(xi, w, b, pad))
            for (w, b), xi in zip(p["intra"], intra_ins)]
    fl = jnp.concatenate(outs, axis=-1)
    pw = _ref_conv1d(fl, p["pw"][0], p["pw"][1], 0)
    inter = _ref_conv1d(inter_in, p["inter"][0], p["inter"][1], pad)
    ol = jax.nn.relu(jnp.concatenate([pw, inter], axis=-1))
    return _ref_pool2(ol), [_ref_pool2(o) for o in outs]


def _ref_tmc_forward(p1, p2, x1, x2, *, padding):
    o1, f1 = _ref_tmc_block(p1, x1, x2, padding)
    return _ref_tmc_block(p2, o1, f1, padding)


# ----------------------------------- main ------------------------------------- #

if __name__ == "__main__":
    out_channels = 16
    features = [16, 8]                     # TMC_Block1 features
    kernel_size, pool_size, padding = 5, 2, 2
    B, T = 2, 16

    key = jax.random.PRNGKey(0)
    kp1, kp2, kx1, kx2a, kx2b = jax.random.split(key, 5)

    params1 = init_tmc_block_params(kp1, out_channels, features, kernel_size)
    block2_features = [out_channels // len(features)] * len(features)   # [8, 8]
    params2 = init_tmc_block_params(kp2, out_channels, block2_features,
                                    kernel_size)

    # layout: (B, T, C)  (PyTorch reference would be (B, C, T))
    x1 = jax.random.normal(kx1, (B, T, sum(features)), jnp.float32)
    x2 = [jax.random.normal(kx2a, (B, T, features[0]), jnp.float32),
          jax.random.normal(kx2b, (B, T, features[1]), jnp.float32)]

    o2, f2 = tmc_forward(params1, params2, x1, x2,
                         kernel_size=kernel_size, padding=padding)
    o2 = jax.block_until_ready(o2)
    f2 = [jax.block_until_ready(f) for f in f2]

    assert o2.shape == (B, T // 4, out_channels), o2.shape
    assert all(f.shape == (B, T // 4, out_channels // 2) for f in f2)

    # numerical cross-check against an independent XLA implementation
    ro2, rf2 = _ref_tmc_forward(params1, params2, x1, x2, padding=padding)
    assert jnp.allclose(o2, ro2, rtol=2e-2, atol=2e-2), "inter-cue output mismatch"
    for f, rf in zip(f2, rf2):
        assert jnp.allclose(f, rf, rtol=2e-2, atol=2e-2), "intra-cue output mismatch"

    print("KERNEL_OK")
</pallas_src>

<mosaic_0001>
module attributes {stable_mosaic.version = 11 : i64} {
  func.func @_tmc_fused_kernel(%arg0: memref<2x16x24xf32, #tpu.memory_space<vmem>>, %arg1: memref<2x16x16xf32, #tpu.memory_space<vmem>>, %arg2: memref<2x16x8xf32, #tpu.memory_space<vmem>>, %arg3: memref<80x8xf32, #tpu.memory_space<vmem>>, %arg4: memref<1x8xf32, #tpu.memory_space<vmem>>, %arg5: memref<40x8xf32, #tpu.memory_space<vmem>>, %arg6: memref<1x8xf32, #tpu.memory_space<vmem>>, %arg7: memref<16x8xf32, #tpu.memory_space<vmem>>, %arg8: memref<1x8xf32, #tpu.memory_space<vmem>>, %arg9: memref<120x8xf32, #tpu.memory_space<vmem>>, %arg10: memref<1x8xf32, #tpu.memory_space<vmem>>, %arg11: memref<40x8xf32, #tpu.memory_space<vmem>>, %arg12: memref<1x8xf32, #tpu.memory_space<vmem>>, %arg13: memref<40x8xf32, #tpu.memory_space<vmem>>, %arg14: memref<1x8xf32, #tpu.memory_space<vmem>>, %arg15: memref<16x8xf32, #tpu.memory_space<vmem>>, %arg16: memref<1x8xf32, #tpu.memory_space<vmem>>, %arg17: memref<80x8xf32, #tpu.memory_space<vmem>>, %arg18: memref<1x8xf32, #tpu.memory_space<vmem>>, %arg19: memref<8x16xf32, #tpu.memory_space<vmem>>, %arg20: memref<8x8xf32, #tpu.memory_space<vmem>>, %arg21: memref<8x8xf32, #tpu.memory_space<vmem>>, %arg22: memref<32x120xf32, #tpu.memory_space<vmem>>, %arg23: memref<32x32xf32, #tpu.memory_space<vmem>>) attributes {dimension_semantics = [], scalar_prefetch = 0 : i64, scratch_operands = 2 : i64, tpu.core_type = #tpu.core_type<tc>} {
    %c0 = arith.constant 0 : index
    %c0_0 = arith.constant 0 : index
    %c0_1 = arith.constant 0 : index
    %0 = vector.load %arg0[%c0, %c0_0, %c0_1] : memref<2x16x24xf32, #tpu.memory_space<vmem>>, vector<1x16x24xf32>
    %1 = vector.shape_cast %0 : vector<1x16x24xf32> to vector<16x24xf32>
    %c1 = arith.constant 1 : index
    %c0_2 = arith.constant 0 : index
    %c0_3 = arith.constant 0 : index
    %2 = vector.load %arg0[%c1, %c0_2, %c0_3] : memref<2x16x24xf32, #tpu.memory_space<vmem>>, vector<1x16x24xf32>
    %3 = vector.shape_cast %2 : vector<1x16x24xf32> to vector<16x24xf32>
    %c0_4 = arith.constant 0 : index
    %c0_5 = arith.constant 0 : index
    %c0_6 = arith.constant 0 : index
    %4 = vector.load %arg1[%c0_4, %c0_5, %c0_6] : memref<2x16x16xf32, #tpu.memory_space<vmem>>, vector<1x16x16xf32>
    %5 = vector.shape_cast %4 : vector<1x16x16xf32> to vector<16x16xf32>
    %c1_7 = arith.constant 1 : index
    %c0_8 = arith.constant 0 : index
    %c0_9 = arith.constant 0 : index
    %6 = vector.load %arg1[%c1_7, %c0_8, %c0_9] : memref<2x16x16xf32, #tpu.memory_space<vmem>>, vector<1x16x16xf32>
    %7 = vector.shape_cast %6 : vector<1x16x16xf32> to vector<16x16xf32>
    %c0_10 = arith.constant 0 : index
    %c0_11 = arith.constant 0 : index
    %c0_12 = arith.constant 0 : index
    %8 = vector.load %arg2[%c0_10, %c0_11, %c0_12] : memref<2x16x8xf32, #tpu.memory_space<vmem>>, vector<1x16x8xf32>
    %9 = vector.shape_cast %8 : vector<1x16x8xf32> to vector<16x8xf32>
    %c1_13 = arith.constant 1 : index
    %c0_14 = arith.constant 0 : index
    %c0_15 = arith.constant 0 : index
    %10 = vector.load %arg2[%c1_13, %c0_14, %c0_15] : memref<2x16x8xf32, #tpu.memory_space<vmem>>, vector<1x16x8xf32>
    %11 = vector.shape_cast %10 : vector<1x16x8xf32> to vector<16x8xf32>
    %cst = arith.constant 0.000000e+00 : f32
    %12 = vector.broadcast %cst : f32 to vector<32x80xf32>
    %c0_16 = arith.constant 0 : index
    %c0_17 = arith.constant 0 : index
    %13 = vector.load %arg22[%c0_16, %c0_17] : memref<32x120xf32, #tpu.memory_space<vmem>>, vector<32x80xf32>
    tpu.vector_store %arg22[%c0_16, %c0_17], %12 {strides = array<i32>} : memref<32x120xf32, #tpu.memory_space<vmem>>, vector<32x80xf32>,
    %14 = vector.extract_strided_slice %5 {offsets = [0, 0], sizes = [14, 16], strides = [1, 1]} : vector<16x16xf32> to vector<14x16xf32>
    %c2 = arith.constant 2 : index
    %c0_18 = arith.constant 0 : index
    %15 = vector.load %arg22[%c2, %c0_18] : memref<32x120xf32, #tpu.memory_space<vmem>>, vector<14x16xf32>
    tpu.vector_store %arg22[%c2, %c0_18], %14 {strides = array<i32>} : memref<32x120xf32, #tpu.memory_space<vmem>>, vector<14x16xf32>,
    %16 = vector.extract_strided_slice %5 {offsets = [0, 0], sizes = [15, 16], strides = [1, 1]} : vector<16x16xf32> to vector<15x16xf32>
    %c1_19 = arith.constant 1 : index
    %c16 = arith.constant 16 : index
    %17 = vector.load %arg22[%c1_19, %c16] : memref<32x120xf32, #tpu.memory_space<vmem>>, vector<15x16xf32>
    tpu.vector_store %arg22[%c1_19, %c16], %16 {strides = array<i32>} : memref<32x120xf32, #tpu.memory_space<vmem>>, vector<15x16xf32>,
    %c0_20 = arith.constant 0 : index
    %c32 = arith.constant 32 : index
    %18 = vector.load %arg22[%c0_20, %c32] : memref<32x120xf32, #tpu.memory_space<vmem>>, vector<16x16xf32>
    tpu.vector_store %arg22[%c0_20, %c32], %5 {strides = array<i32>} : memref<32x120xf32, #tpu.memory_space<vmem>>, vector<16x16xf32>,
    %19 = vector.extract_strided_slice %5 {offsets = [1, 0], sizes = [15, 16], strides = [1, 1]} : vector<16x16xf32> to vector<15x16xf32>
    %c0_21 = arith.constant 0 : index
    %c48 = arith.constant 48 : index
    %20 = vector.load %arg22[%c0_21, %c48] : memref<32x120xf32, #tpu.memory_space<vmem>>, vector<15x16xf32>
    tpu.vector_store %arg22[%c0_21, %c48], %19 {strides = array<i32>} : memref<32x120xf32, #tpu.memory_space<vmem>>, vector<15x16xf32>,
    %21 = vector.extract_strided_slice %5 {offsets = [2, 0], sizes = [14, 16], strides = [1, 1]} : vector<16x16xf32> to vector<14x16xf32>
    %c0_22 = arith.constant 0 : index
    %c64 = arith.constant 64 : index
    %22 = vector.load %arg22[%c0_22, %c64] : memref<32x120xf32, #tpu.memory_space<vmem>>, vector<14x16xf32>
    tpu.vector_store %arg22[%c0_22, %c64], %21 {strides = array<i32>} : memref<32x120xf32, #tpu.memory_space<vmem>>, vector<14x16xf32>,
    %23 = vector.extract_strided_slice %7 {offsets = [0, 0], sizes = [14, 16], strides = [1, 1]} : vector<16x16xf32> to vector<14x16xf32>
    %c18 = arith.constant 18 : index
    %c0_23 = arith.constant 0 : index
    %24 = vector.load %arg22[%c18, %c0_23] : memref<32x120xf32, #tpu.memory_space<vmem>>, vector<14x16xf32>
    tpu.vector_store %arg22[%c18, %c0_23], %23 {strides = array<i32>} : memref<32x120xf32, #tpu.memory_space<vmem>>, vector<14x16xf32>,
    %25 = vector.extract_strided_slice %7 {offsets = [0, 0], sizes = [15, 16], strides = [1, 1]} : vector<16x16xf32> to vector<15x16xf32>
    %c17 = arith.constant 17 : index
    %c16_24 = arith.constant 16 : index
    %26 = vector.load %arg22[%c17, %c16_24] : memref<32x120xf32, #tpu.memory_space<vmem>>, vector<15x16xf32>
    tpu.vector_store %arg22[%c17, %c16_24], %25 {strides = array<i32>} : memref<32x120xf32, #tpu.memory_space<vmem>>, vector<15x16xf32>,
    %c16_25 = arith.constant 16 : index
    %c32_26 = arith.constant 32 : index
    %27 = vector.load %arg22[%c16_25, %c32_26] : memref<32x120xf32, #tpu.memory_space<vmem>>, vector<16x16xf32>
    tpu.vector_store %arg22[%c16_25, %c32_26], %7 {strides = array<i32>} : memref<32x120xf32, #tpu.memory_space<vmem>>, vector<16x16xf32>,
    %28 = vector.extract_strided_slice %7 {offsets = [1, 0], sizes = [15, 16], strides = [1, 1]} : vector<16x16xf32> to vector<15x16xf32>
    %c16_27 = arith.constant 16 : index
    %c48_28 = arith.constant 48 : index
    %29 = vector.load %arg22[%c16_27, %c48_28] : memref<32x120xf32, #tpu.memory_space<vmem>>, vector<15x16xf32>
    tpu.vector_store %arg22[%c16_27, %c48_28], %28 {strides = array<i32>} : memref<32x120xf32, #tpu.memory_space<vmem>>, vector<15x16xf32>,
    %30 = vector.extract_strided_slice %7 {offsets = [2, 0], sizes = [14, 16], strides = [1, 1]} : vector<16x16xf32> to vector<14x16xf32>
    %c16_29 = arith.constant 16 : index
    %c64_30 = arith.constant 64 : index
    %31 = vector.load %arg22[%c16_29, %c64_30] : memref<32x120xf32, #tpu.memory_space<vmem>>, vector<14x16xf32>
    tpu.vector_store %arg22[%c16_29, %c64_30], %30 {strides = array<i32>} : memref<32x120xf32, #tpu.memory_space<vmem>>, vector<14x16xf32>,
    %c0_31 = arith.constant 0 : index
    %c0_32 = arith.constant 0 : index
    %32 = vector.load %arg22[%c0_31, %c0_32] : memref<32x120xf32, #tpu.memory_space<vmem>>, vector<32x80xf32>
    %c0_33 = arith.constant 0 : index
    %c0_34 = arith.constant 0 : index
    %33 = vector.load %arg3[%c0_33, %c0_34] : memref<80x8xf32, #tpu.memory_space<vmem>>, vector<80x8xf32>
    %cst_35 = arith.constant dense<0.000000e+00> : vector<32x8xf32>
    %34 = tpu.matmul %32, %33, %cst_35 {dimension_numbers = #tpu.dot_dimension_numbers<[1], [0], [0], [1], [0, 0, 1, 1], [], []>} : vector<32x80xf32>, vector<80x8xf32>, vector<32x8xf32> -> vector<32x8xf32>
    %c0_36 = arith.constant 0 : index
    %c0_37 = arith.constant 0 : index
    %35 = vector.load %arg4[%c0_36, %c0_37] : memref<1x8xf32, #tpu.memory_space<vmem>>, vector<1x8xf32>
    %36 = vector.broadcast %35 : vector<1x8xf32> to vector<32x8xf32>
    %37 = arith.addf %34, %36 : vector<32x8xf32>
    %cst_38 = arith.constant 0.000000e+00 : f32
    %38 = vector.broadcast %cst_38 : f32 to vector<32x8xf32>
    %39 = arith.maximumf %37, %38 : vector<32x8xf32>
    %c0_39 = arith.constant 0 : index
    %c16_40 = arith.constant 16 : index
    %40 = vector.load %arg23[%c0_39, %c16_40] : memref<32x32xf32, #tpu.memory_space<vmem>>, vector<32x8xf32>
    tpu.vector_store %arg23[%c0_39, %c16_40], %39 {strides = array<i32>} : memref<32x32xf32, #tpu.memory_space<vmem>>, vector<32x8xf32>,
    %cst_41 = arith.constant 0.000000e+00 : f32
    %41 = vector.broadcast %cst_41 : f32 to vector<32x40xf32>
    %c0_42 = arith.constant 0 : index
    %c0_43 = arith.constant 0 : index
    %42 = vector.load %arg22[%c0_42, %c0_43] : memref<32x120xf32, #tpu.memory_space<vmem>>, vector<32x40xf32>
    tpu.vector_store %arg22[%c0_42, %c0_43], %41 {strides = array<i32>} : memref<32x120xf32, #tpu.memory_space<vmem>>, vector<32x40xf32>,
    %43 = vector.extract_strided_slice %9 {offsets = [0, 0], sizes = [14, 8], strides = [1, 1]} : vector<16x8xf32> to vector<14x8xf32>
    %c2_44 = arith.constant 2 : index
    %c0_45 = arith.constant 0 : index
    %44 = vector.load %arg22[%c2_44, %c0_45] : memref<32x120xf32, #tpu.memory_space<vmem>>, vector<14x8xf32>
    tpu.vector_store %arg22[%c2_44, %c0_45], %43 {strides = array<i32>} : memref<32x120xf32, #tpu.memory_space<vmem>>, vector<14x8xf32>,
    %45 = vector.extract_strided_slice %9 {offsets = [0, 0], sizes = [15, 8], strides = [1, 1]} : vector<16x8xf32> to vector<15x8xf32>
    %c1_46 = arith.constant 1 : index
    %c8 = arith.constant 8 : index
    %46 = vector.load %arg22[%c1_46, %c8] : memref<32x120xf32, #tpu.memory_space<vmem>>, vector<15x8xf32>
    tpu.vector_store %arg22[%c1_46, %c8], %45 {strides = array<i32>} : memref<32x120xf32, #tpu.memory_space<vmem>>, vector<15x8xf32>,
    %c0_47 = arith.constant 0 : index
    %c16_48 = arith.constant 16 : index
    %47 = vector.load %arg22[%c0_47, %c16_48] : memref<32x120xf32, #tpu.memory_space<vmem>>, vector<16x8xf32>
    tpu.vector_store %arg22[%c0_47, %c16_48], %9 {strides = array<i32>} : memref<32x120xf32, #tpu.memory_space<vmem>>, vector<16x8xf32>,
    %48 = vector.extract_strided_slice %9 {offsets = [1, 0], sizes = [15, 8], strides = [1, 1]} : vector<16x8xf32> to vector<15x8xf32>
    %c0_49 = arith.constant 0 : index
    %c24 = arith.constant 24 : index
    %49 = vector.load %arg22[%c0_49, %c24] : memref<32x120xf32, #tpu.memory_space<vmem>>, vector<15x8xf32>
    tpu.vector_store %arg22[%c0_49, %c24], %48 {strides = array<i32>} : memref<32x120xf32, #tpu.memory_space<vmem>>, vector<15x8xf32>,
    %50 = vector.extract_strided_slice %9 {offsets = [2, 0], sizes = [14, 8], strides = [1, 1]} : vector<16x8xf32> to vector<14x8xf32>
    %c0_50 = arith.constant 0 : index
    %c32_51 = arith.constant 32 : index
    %51 = vector.load %arg22[%c0_50, %c32_51] : memref<32x120xf32, #tpu.memory_space<vmem>>, vector<14x8xf32>
    tpu.vector_store %arg22[%c0_50, %c32_51], %50 {strides = array<i32>} : memref<32x120xf32, #tpu.memory_space<vmem>>, vector<14x8xf32>,
    %52 = vector.extract_strided_slice %11 {offsets = [0, 0], sizes = [14, 8], strides = [1, 1]} : vector<16x8xf32> to vector<14x8xf32>
    %c18_52 = arith.constant 18 : index
    %c0_53 = arith.constant 0 : index
    %53 = vector.load %arg22[%c18_52, %c0_53] : memref<32x120xf32, #tpu.memory_space<vmem>>, vector<14x8xf32>
    tpu.vector_store %arg22[%c18_52, %c0_53], %52 {strides = array<i32>} : memref<32x120xf32, #tpu.memory_space<vmem>>, vector<14x8xf32>,
    %54 = vector.extract_strided_slice %11 {offsets = [0, 0], sizes = [15, 8], strides = [1, 1]} : vector<16x8xf32> to vector<15x8xf32>
    %c17_54 = arith.constant 17 : index
    %c8_55 = arith.constant 8 : index
    %55 = vector.load %arg22[%c17_54, %c8_55] : memref<32x120xf32, #tpu.memory_space<vmem>>, vector<15x8xf32>
    tpu.vector_store %arg22[%c17_54, %c8_55], %54 {strides = array<i32>} : memref<32x120xf32, #tpu.memory_space<vmem>>, vector<15x8xf32>,
    %c16_56 = arith.constant 16 : index
    %c16_57 = arith.constant 16 : index
    %56 = vector.load %arg22[%c16_56, %c16_57] : memref<32x120xf32, #tpu.memory_space<vmem>>, vector<16x8xf32>
    tpu.vector_store %arg22[%c16_56, %c16_57], %11 {strides = array<i32>} : memref<32x120xf32, #tpu.memory_space<vmem>>, vector<16x8xf32>,
    %57 = vector.extract_strided_slice %11 {offsets = [1, 0], sizes = [15, 8], strides = [1, 1]} : vector<16x8xf32> to vector<15x8xf32>
    %c16_58 = arith.constant 16 : index
    %c24_59 = arith.constant 24 : index
    %58 = vector.load %arg22[%c16_58, %c24_59] : memref<32x120xf32, #tpu.memory_space<vmem>>, vector<15x8xf32>
    tpu.vector_store %arg22[%c16_58, %c24_59], %57 {strides = array<i32>} : memref<32x120xf32, #tpu.memory_space<vmem>>, vector<15x8xf32>,
    %59 = vector.extract_strided_slice %11 {offsets = [2, 0], sizes = [14, 8], strides = [1, 1]} : vector<16x8xf32> to vector<14x8xf32>
    %c16_60 = arith.constant 16 : index
    %c32_61 = arith.constant 32 : index
    %60 = vector.load %arg22[%c16_60, %c32_61] : memref<32x120xf32, #tpu.memory_space<vmem>>, vector<14x8xf32>
    tpu.vector_store %arg22[%c16_60, %c32_61], %59 {strides = array<i32>} : memref<32x120xf32, #tpu.memory_space<vmem>>, vector<14x8xf32>,
    %c0_62 = arith.constant 0 : index
    %c0_63 = arith.constant 0 : index
    %61 = vector.load %arg22[%c0_62, %c0_63] : memref<32x120xf32, #tpu.memory_space<vmem>>, vector<32x40xf32>
    %c0_64 = arith.constant 0 : index
    %c0_65 = arith.constant 0 : index
    %62 = vector.load %arg5[%c0_64, %c0_65] : memref<40x8xf32, #tpu.memory_space<vmem>>, vector<40x8xf32>
    %cst_66 = arith.constant dense<0.000000e+00> : vector<32x8xf32>
    %63 = tpu.matmul %61, %62, %cst_66 {dimension_numbers = #tpu.dot_dimension_numbers<[1], [0], [0], [1], [0, 0, 1, 1], [], []>} : vector<32x40xf32>, vector<40x8xf32>, vector<32x8xf32> -> vector<32x8xf32>
    %c0_67 = arith.constant 0 : index
    %c0_68 = arith.constant 0 : index
    %64 = vector.load %arg6[%c0_67, %c0_68] : memref<1x8xf32, #tpu.memory_space<vmem>>, vector<1x8xf32>
    %65 = vector.broadcast %64 : vector<1x8xf32> to vector<32x8xf32>
    %66 = arith.addf %63, %65 : vector<32x8xf32>
    %cst_69 = arith.constant 0.000000e+00 : f32
    %67 = vector.broadcast %cst_69 : f32 to vector<32x8xf32>
    %68 = arith.maximumf %66, %67 : vector<32x8xf32>
    %c0_70 = arith.constant 0 : index
    %c24_71 = arith.constant 24 : index
    %69 = vector.load %arg23[%c0_70, %c24_71] : memref<32x32xf32, #tpu.memory_space<vmem>>, vector<32x8xf32>
    tpu.vector_store %arg23[%c0_70, %c24_71], %68 {strides = array<i32>} : memref<32x32xf32, #tpu.memory_space<vmem>>, vector<32x8xf32>,
    %c0_72 = arith.constant 0 : index
    %c16_73 = arith.constant 16 : index
    %70 = vector.load %arg23[%c0_72, %c16_73] : memref<32x32xf32, #tpu.memory_space<vmem>>, vector<32x16xf32>
    %c0_74 = arith.constant 0 : index
    %c0_75 = arith.constant 0 : index
    %71 = vector.load %arg7[%c0_74, %c0_75] : memref<16x8xf32, #tpu.memory_space<vmem>>, vector<16x8xf32>
    %cst_76 = arith.constant dense<0.000000e+00> : vector<32x8xf32>
    %72 = tpu.matmul %70, %71, %cst_76 {dimension_numbers = #tpu.dot_dimension_numbers<[1], [0], [0], [1], [0, 0, 1, 1], [], []>} : vector<32x16xf32>, vector<16x8xf32>, vector<32x8xf32> -> vector<32x8xf32>
    %c0_77 = arith.constant 0 : index
    %c0_78 = arith.constant 0 : index
    %73 = vector.load %arg8[%c0_77, %c0_78] : memref<1x8xf32, #tpu.memory_space<vmem>>, vector<1x8xf32>
    %74 = vector.broadcast %73 : vector<1x8xf32> to vector<32x8xf32>
    %75 = arith.addf %72, %74 : vector<32x8xf32>
    %c0_79 = arith.constant 0 : index
    %c0_80 = arith.constant 0 : index
    %76 = vector.load %arg23[%c0_79, %c0_80] : memref<32x32xf32, #tpu.memory_space<vmem>>, vector<32x8xf32>
    tpu.vector_store %arg23[%c0_79, %c0_80], %75 {strides = array<i32>} : memref<32x32xf32, #tpu.memory_space<vmem>>, vector<32x8xf32>,
    %cst_81 = arith.constant 0.000000e+00 : f32
    %77 = vector.broadcast %cst_81 : f32 to vector<32x120xf32>
    %c0_82 = arith.constant 0 : index
    %c0_83 = arith.constant 0 : index
    %78 = vector.load %arg22[%c0_82, %c0_83] : memref<32x120xf32, #tpu.memory_space<vmem>>, vector<32x120xf32>
    tpu.vector_store %arg22[%c0_82, %c0_83], %77 {strides = array<i32>} : memref<32x120xf32, #tpu.memory_space<vmem>>, vector<32x120xf32>,
    %79 = vector.extract_strided_slice %1 {offsets = [0, 0], sizes = [14, 24], strides = [1, 1]} : vector<16x24xf32> to vector<14x24xf32>
    %c2_84 = arith.constant 2 : index
    %c0_85 = arith.constant 0 : index
    %80 = vector.load %arg22[%c2_84, %c0_85] : memref<32x120xf32, #tpu.memory_space<vmem>>, vector<14x24xf32>
    tpu.vector_store %arg22[%c2_84, %c0_85], %79 {strides = array<i32>} : memref<32x120xf32, #tpu.memory_space<vmem>>, vector<14x24xf32>,
    %81 = vector.extract_strided_slice %1 {offsets = [0, 0], sizes = [15, 24], strides = [1, 1]} : vector<16x24xf32> to vector<15x24xf32>
    %c1_86 = arith.constant 1 : index
    %c24_87 = arith.constant 24 : index
    %82 = vector.load %arg22[%c1_86, %c24_87] : memref<32x120xf32, #tpu.memory_space<vmem>>, vector<15x24xf32>
    tpu.vector_store %arg22[%c1_86, %c24_87], %81 {strides = array<i32>} : memref<32x120xf32, #tpu.memory_space<vmem>>, vector<15x24xf32>,
    %c0_88 = arith.constant 0 : index
    %c48_89 = arith.constant 48 : index
    %83 = vector.load %arg22[%c0_88, %c48_89] : memref<32x120xf32, #tpu.memory_space<vmem>>, vector<16x24xf32>
    tpu.vector_store %arg22[%c0_88, %c48_89], %1 {strides = array<i32>} : memref<32x120xf32, #tpu.memory_space<vmem>>, vector<16x24xf32>,
    %84 = vector.extract_strided_slice %1 {offsets = [1, 0], sizes = [15, 24], strides = [1, 1]} : vector<16x24xf32> to vector<15x24xf32>
    %c0_90 = arith.constant 0 : index
    %c72 = arith.constant 72 : index
    %85 = vector.load %arg22[%c0_90, %c72] : memref<32x120xf32, #tpu.memory_space<vmem>>, vector<15x24xf32>
    tpu.vector_store %arg22[%c0_90, %c72], %84 {strides = array<i32>} : memref<32x120xf32, #tpu.memory_space<vmem>>, vector<15x24xf32>,
    %86 = vector.extract_strided_slice %1 {offsets = [2, 0], sizes = [14, 24], strides = [1, 1]} : vector<16x24xf32> to vector<14x24xf32>
    %c0_91 = arith.constant 0 : index
    %c96 = arith.constant 96 : index
    %87 = vector.load %arg22[%c0_91, %c96] : memref<32x120xf32, #tpu.memory_space<vmem>>, vector<14x24xf32>
    tpu.vector_store %arg22[%c0_91, %c96], %86 {strides = array<i32>} : memref<32x120xf32, #tpu.memory_space<vmem>>, vector<14x24xf32>,
    %88 = vector.extract_strided_slice %3 {offsets = [0, 0], sizes = [14, 24], strides = [1, 1]} : vector<16x24xf32> to vector<14x24xf32>
    %c18_92 = arith.constant 18 : index
    %c0_93 = arith.constant 0 : index
    %89 = vector.load %arg22[%c18_92, %c0_93] : memref<32x120xf32, #tpu.memory_space<vmem>>, vector<14x24xf32>
    tpu.vector_store %arg22[%c18_92, %c0_93], %88 {strides = array<i32>} : memref<32x120xf32, #tpu.memory_space<vmem>>, vector<14x24xf32>,
    %90 = vector.extract_strided_slice %3 {offsets = [0, 0], sizes = [15, 24], strides = [1, 1]} : vector<16x24xf32> to vector<15x24xf32>
    %c17_94 = arith.constant 17 : index
    %c24_95 = arith.constant 24 : index
    %91 = vector.load %arg22[%c17_94, %c24_95] : memref<32x120xf32, #tpu.memory_space<vmem>>, vector<15x24xf32>
    tpu.vector_store %arg22[%c17_94, %c24_95], %90 {strides = array<i32>} : memref<32x120xf32, #tpu.memory_space<vmem>>, vector<15x24xf32>,
    %c16_96 = arith.constant 16 : index
    %c48_97 = arith.constant 48 : index
    %92 = vector.load %arg22[%c16_96, %c48_97] : memref<32x120xf32, #tpu.memory_space<vmem>>, vector<16x24xf32>
    tpu.vector_store %arg22[%c16_96, %c48_97], %3 {strides = array<i32>} : memref<32x120xf32, #tpu.memory_space<vmem>>, vector<16x24xf32>,
    %93 = vector.extract_strided_slice %3 {offsets = [1, 0], sizes = [15, 24], strides = [1, 1]} : vector<16x24xf32> to vector<15x24xf32>
    %c16_98 = arith.constant 16 : index
    %c72_99 = arith.constant 72 : index
    %94 = vector.load %arg22[%c16_98, %c72_99] : memref<32x120xf32, #tpu.memory_space<vmem>>, vector<15x24xf32>
    tpu.vector_store %arg22[%c16_98, %c72_99], %93 {strides = array<i32>} : memref<32x120xf32, #tpu.memory_space<vmem>>, vector<15x24xf32>,
    %95 = vector.extract_strided_slice %3 {offsets = [2, 0], sizes = [14, 24], strides = [1, 1]} : vector<16x24xf32> to vector<14x24xf32>
    %c16_100 = arith.constant 16 : index
    %c96_101 = arith.constant 96 : index
    %96 = vector.load %arg22[%c16_100, %c96_101] : memref<32x120xf32, #tpu.memory_space<vmem>>, vector<14x24xf32>
    tpu.vector_store %arg22[%c16_100, %c96_101], %95 {strides = array<i32>} : memref<32x120xf32, #tpu.memory_space<vmem>>, vector<14x24xf32>,
    %c0_102 = arith.constant 0 : index
    %c0_103 = arith.constant 0 : index
    %97 = vector.load %arg22[%c0_102, %c0_103] : memref<32x120xf32, #tpu.memory_space<vmem>>, vector<32x120xf32>
    %c0_104 = arith.constant 0 : index
    %c0_105 = arith.constant 0 : index
    %98 = vector.load %arg9[%c0_104, %c0_105] : memref<120x8xf32, #tpu.memory_space<vmem>>, vector<120x8xf32>
    %cst_106 = arith.constant dense<0.000000e+00> : vector<32x8xf32>
    %99 = tpu.matmul %97, %98, %cst_106 {dimension_numbers = #tpu.dot_dimension_numbers<[1], [0], [0], [1], [0, 0, 1, 1], [], []>} : vector<32x120xf32>, vector<120x8xf32>, vector<32x8xf32> -> vector<32x8xf32>
    %c0_107 = arith.constant 0 : index
    %c0_108 = arith.constant 0 : index
    %100 = vector.load %arg10[%c0_107, %c0_108] : memref<1x8xf32, #tpu.memory_space<vmem>>, vector<1x8xf32>
    %101 = vector.broadcast %100 : vector<1x8xf32> to vector<32x8xf32>
    %102 = arith.addf %99, %101 : vector<32x8xf32>
    %c0_109 = arith.constant 0 : index
    %c8_110 = arith.constant 8 : index
    %103 = vector.load %arg23[%c0_109, %c8_110] : memref<32x32xf32, #tpu.memory_space<vmem>>, vector<32x8xf32>
    tpu.vector_store %arg23[%c0_109, %c8_110], %102 {strides = array<i32>} : memref<32x32xf32, #tpu.memory_space<vmem>>, vector<32x8xf32>,
    %c0_111 = arith.constant 0 : index
    %c0_112 = arith.constant 0 : index
    %104 = vector.load %arg23[%c0_111, %c0_112] : memref<32x32xf32, #tpu.memory_space<vmem>>, vector<32x32xf32>
    %cst_113 = arith.constant 0.000000e+00 : f32
    %105 = vector.broadcast %cst_113 : f32 to vector<32x32xf32>
    %106 = arith.maximumf %104, %105 : vector<32x32xf32>
    %107 = tpu.iota {dimensions = array<i32: 0>} : vector<16x32xi32>
    %108 = tpu.iota {dimensions = array<i32: 1>} : vector<16x32xi32>
    %c2_i32 = arith.constant 2 : i32
    %109 = vector.broadcast %c2_i32 : i32 to vector<16x32xi32>
    %110 = arith.muli %109, %107 : vector<16x32xi32>
    %111 = arith.cmpi eq, %108, %110 : vector<16x32xi32>
    %112 = arith.extui %111 : vector<16x32xi1> to vector<16x32xi32>
    %113 = arith.sitofp %112 : vector<16x32xi32> to vector<16x32xf32>
    %c2_i32_114 = arith.constant 2 : i32
    %114 = vector.broadcast %c2_i32_114 : i32 to vector<16x32xi32>
    %115 = arith.muli %114, %107 : vector<16x32xi32>
    %c1_i32 = arith.constant 1 : i32
    %116 = vector.broadcast %c1_i32 : i32 to vector<16x32xi32>
    %117 = arith.addi %115, %116 : vector<16x32xi32>
    %118 = arith.cmpi eq, %108, %117 : vector<16x32xi32>
    %119 = arith.extui %118 : vector<16x32xi1> to vector<16x32xi32>
    %120 = arith.sitofp %119 : vector<16x32xi32> to vector<16x32xf32>
    %cst_115 = arith.constant dense<0.000000e+00> : vector<16x32xf32>
    %121 = tpu.matmul %113, %106, %cst_115 {dimension_numbers = #tpu.dot_dimension_numbers<[1], [0], [0], [1], [0, 0, 1, 1], [], []>} : vector<16x32xf32>, vector<32x32xf32>, vector<16x32xf32> -> vector<16x32xf32>
    %cst_116 = arith.constant dense<0.000000e+00> : vector<16x32xf32>
    %122 = tpu.matmul %120, %106, %cst_116 {dimension_numbers = #tpu.dot_dimension_numbers<[1], [0], [0], [1], [0, 0, 1, 1], [], []>} : vector<16x32xf32>, vector<32x32xf32>, vector<16x32xf32> -> vector<16x32xf32>
    %123 = arith.maximumf %121, %122 : vector<16x32xf32>
    %124 = vector.extract_strided_slice %123 {offsets = [0, 0], sizes = [16, 16], strides = [1, 1]} : vector<16x32xf32> to vector<16x16xf32>
    %125 = vector.extract_strided_slice %123 {offsets = [0, 16], sizes = [16, 8], strides = [1, 1]} : vector<16x32xf32> to vector<16x8xf32>
    %126 = vector.extract_strided_slice %123 {offsets = [0, 24], sizes = [16, 8], strides = [1, 1]} : vector<16x32xf32> to vector<16x8xf32>
    %127 = vector.extract_strided_slice %124 {offsets = [0, 0], sizes = [8, 16], strides = [1, 1]} : vector<16x16xf32> to vector<8x16xf32>
    %128 = vector.extract_strided_slice %124 {offsets = [8, 0], sizes = [8, 16], strides = [1, 1]} : vector<16x16xf32> to vector<8x16xf32>
    %129 = vector.extract_strided_slice %125 {offsets = [0, 0], sizes = [8, 8], strides = [1, 1]} : vector<16x8xf32> to vector<8x8xf32>
    %130 = vector.extract_strided_slice %125 {offsets = [8, 0], sizes = [8, 8], strides = [1, 1]} : vector<16x8xf32> to vector<8x8xf32>
    %131 = vector.extract_strided_slice %126 {offsets = [0, 0], sizes = [8, 8], strides = [1, 1]} : vector<16x8xf32> to vector<8x8xf32>
    %132 = vector.extract_strided_slice %126 {offsets = [8, 0], sizes = [8, 8], strides = [1, 1]} : vector<16x8xf32> to vector<8x8xf32>
    %cst_117 = arith.constant 0.000000e+00 : f32
    %133 = vector.broadcast %cst_117 : f32 to vector<16x40xf32>
    %c0_118 = arith.constant 0 : index
    %c0_119 = arith.constant 0 : index
    %134 = vector.load %arg22[%c0_118, %c0_119] : memref<32x120xf32, #tpu.memory_space<vmem>>, vector<16x40xf32>
    tpu.vector_store %arg22[%c0_118, %c0_119], %133 {strides = array<i32>} : memref<32x120xf32, #tpu.memory_space<vmem>>, vector<16x40xf32>,
    %135 = vector.extract_strided_slice %129 {offsets = [0, 0], sizes = [6, 8], strides = [1, 1]} : vector<8x8xf32> to vector<6x8xf32>
    %c2_120 = arith.constant 2 : index
    %c0_121 = arith.constant 0 : index
    %136 = vector.load %arg22[%c2_120, %c0_121] : memref<32x120xf32, #tpu.memory_space<vmem>>, vector<6x8xf32>
    tpu.vector_store %arg22[%c2_120, %c0_121], %135 {strides = array<i32>} : memref<32x120xf32, #tpu.memory_space<vmem>>, vector<6x8xf32>,
    %137 = vector.extract_strided_slice %129 {offsets = [0, 0], sizes = [7, 8], strides = [1, 1]} : vector<8x8xf32> to vector<7x8xf32>
    %c1_122 = arith.constant 1 : index
    %c8_123 = arith.constant 8 : index
    %138 = vector.load %arg22[%c1_122, %c8_123] : memref<32x120xf32, #tpu.memory_space<vmem>>, vector<7x8xf32>
    tpu.vector_store %arg22[%c1_122, %c8_123], %137 {strides = array<i32>} : memref<32x120xf32, #tpu.memory_space<vmem>>, vector<7x8xf32>,
    %c0_124 = arith.constant 0 : index
    %c16_125 = arith.constant 16 : index
    %139 = vector.load %arg22[%c0_124, %c16_125] : memref<32x120xf32, #tpu.memory_space<vmem>>, vector<8x8xf32>
    tpu.vector_store %arg22[%c0_124, %c16_125], %129 {strides = array<i32>} : memref<32x120xf32, #tpu.memory_space<vmem>>, vector<8x8xf32>,
    %140 = vector.extract_strided_slice %129 {offsets = [1, 0], sizes = [7, 8], strides = [1, 1]} : vector<8x8xf32> to vector<7x8xf32>
    %c0_126 = arith.constant 0 : index
    %c24_127 = arith.constant 24 : index
    %141 = vector.load %arg22[%c0_126, %c24_127] : memref<32x120xf32, #tpu.memory_space<vmem>>, vector<7x8xf32>
    tpu.vector_store %arg22[%c0_126, %c24_127], %140 {strides = array<i32>} : memref<32x120xf32, #tpu.memory_space<vmem>>, vector<7x8xf32>,
    %142 = vector.extract_strided_slice %129 {offsets = [2, 0], sizes = [6, 8], strides = [1, 1]} : vector<8x8xf32> to vector<6x8xf32>
    %c0_128 = arith.constant 0 : index
    %c32_129 = arith.constant 32 : index
    %143 = vector.load %arg22[%c0_128, %c32_129] : memref<32x120xf32, #tpu.memory_space<vmem>>, vector<6x8xf32>
    tpu.vector_store %arg22[%c0_128, %c32_129], %142 {strides = array<i32>} : memref<32x120xf32, #tpu.memory_space<vmem>>, vector<6x8xf32>,
    %144 = vector.extract_strided_slice %130 {offsets = [0, 0], sizes = [6, 8], strides = [1, 1]} : vector<8x8xf32> to vector<6x8xf32>
    %c10 = arith.constant 10 : index
    %c0_130 = arith.constant 0 : index
    %145 = vector.load %arg22[%c10, %c0_130] : memref<32x120xf32, #tpu.memory_space<vmem>>, vector<6x8xf32>
    tpu.vector_store %arg22[%c10, %c0_130], %144 {strides = array<i32>} : memref<32x120xf32, #tpu.memory_space<vmem>>, vector<6x8xf32>,
    %146 = vector.extract_strided_slice %130 {offsets = [0, 0], sizes = [7, 8], strides = [1, 1]} : vector<8x8xf32> to vector<7x8xf32>
    %c9 = arith.constant 9 : index
    %c8_131 = arith.constant 8 : index
    %147 = vector.load %arg22[%c9, %c8_131] : memref<32x120xf32, #tpu.memory_space<vmem>>, vector<7x8xf32>
    tpu.vector_store %arg22[%c9, %c8_131], %146 {strides = array<i32>} : memref<32x120xf32, #tpu.memory_space<vmem>>, vector<7x8xf32>,
    %c8_132 = arith.constant 8 : index
    %c16_133 = arith.constant 16 : index
    %148 = vector.load %arg22[%c8_132, %c16_133] : memref<32x120xf32, #tpu.memory_space<vmem>>, vector<8x8xf32>
    tpu.vector_store %arg22[%c8_132, %c16_133], %130 {strides = array<i32>} : memref<32x120xf32, #tpu.memory_space<vmem>>, vector<8x8xf32>,
    %149 = vector.extract_strided_slice %130 {offsets = [1, 0], sizes = [7, 8], strides = [1, 1]} : vector<8x8xf32> to vector<7x8xf32>
    %c8_134 = arith.constant 8 : index
    %c24_135 = arith.constant 24 : index
    %150 = vector.load %arg22[%c8_134, %c24_135] : memref<32x120xf32, #tpu.memory_space<vmem>>, vector<7x8xf32>
    tpu.vector_store %arg22[%c8_134, %c24_135], %149 {strides = array<i32>} : memref<32x120xf32, #tpu.memory_space<vmem>>, vector<7x8xf32>,
    %151 = vector.extract_strided_slice %130 {offsets = [2, 0], sizes = [6, 8], strides = [1, 1]} : vector<8x8xf32> to vector<6x8xf32>
    %c8_136 = arith.constant 8 : index
    %c32_137 = arith.constant 32 : index
    %152 = vector.load %arg22[%c8_136, %c32_137] : memref<32x120xf32, #tpu.memory_space<vmem>>, vector<6x8xf32>
    tpu.vector_store %arg22[%c8_136, %c32_137], %151 {strides = array<i32>} : memref<32x120xf32, #tpu.memory_space<vmem>>, vector<6x8xf32>,
    %c0_138 = arith.constant 0 : index
    %c0_139 = arith.constant 0 : index
    %153 = vector.load %arg22[%c0_138, %c0_139] : memref<32x120xf32, #tpu.memory_space<vmem>>, vector<16x40xf32>
    %c0_140 = arith.constant 0 : index
    %c0_141 = arith.constant 0 : index
    %154 = vector.load %arg11[%c0_140, %c0_141] : memref<40x8xf32, #tpu.memory_space<vmem>>, vector<40x8xf32>
    %cst_142 = arith.constant dense<0.000000e+00> : vector<16x8xf32>
    %155 = tpu.matmul %153, %154, %cst_142 {dimension_numbers = #tpu.dot_dimension_numbers<[1], [0], [0], [1], [0, 0, 1, 1], [], []>} : vector<16x40xf32>, vector<40x8xf32>, vector<16x8xf32> -> vector<16x8xf32>
    %c0_143 = arith.constant 0 : index
    %c0_144 = arith.constant 0 : index
    %156 = vector.load %arg12[%c0_143, %c0_144] : memref<1x8xf32, #tpu.memory_space<vmem>>, vector<1x8xf32>
    %157 = vector.broadcast %156 : vector<1x8xf32> to vector<16x8xf32>
    %158 = arith.addf %155, %157 : vector<16x8xf32>
    %cst_145 = arith.constant 0.000000e+00 : f32
    %159 = vector.broadcast %cst_145 : f32 to vector<16x8xf32>
    %160 = arith.maximumf %158, %159 : vector<16x8xf32>
    %c0_146 = arith.constant 0 : index
    %c16_147 = arith.constant 16 : index
    %161 = vector.load %arg23[%c0_146, %c16_147] : memref<32x32xf32, #tpu.memory_space<vmem>>, vector<16x8xf32>
    tpu.vector_store %arg23[%c0_146, %c16_147], %160 {strides = array<i32>} : memref<32x32xf32, #tpu.memory_space<vmem>>, vector<16x8xf32>,
    %cst_148 = arith.constant 0.000000e+00 : f32
    %162 = vector.broadcast %cst_148 : f32 to vector<16x40xf32>
    %c0_149 = arith.constant 0 : index
    %c0_150 = arith.constant 0 : index
    %163 = vector.load %arg22[%c0_149, %c0_150] : memref<32x120xf32, #tpu.memory_space<vmem>>, vector<16x40xf32>
    tpu.vector_store %arg22[%c0_149, %c0_150], %162 {strides = array<i32>} : memref<32x120xf32, #tpu.memory_space<vmem>>, vector<16x40xf32>,
    %164 = vector.extract_strided_slice %131 {offsets = [0, 0], sizes = [6, 8], strides = [1, 1]} : vector<8x8xf32> to vector<6x8xf32>
    %c2_151 = arith.constant 2 : index
    %c0_152 = arith.constant 0 : index
    %165 = vector.load %arg22[%c2_151, %c0_152] : memref<32x120xf32, #tpu.memory_space<vmem>>, vector<6x8xf32>
    tpu.vector_store %arg22[%c2_151, %c0_152], %164 {strides = array<i32>} : memref<32x120xf32, #tpu.memory_space<vmem>>, vector<6x8xf32>,
    %166 = vector.extract_strided_slice %131 {offsets = [0, 0], sizes = [7, 8], strides = [1, 1]} : vector<8x8xf32> to vector<7x8xf32>
    %c1_153 = arith.constant 1 : index
    %c8_154 = arith.constant 8 : index
    %167 = vector.load %arg22[%c1_153, %c8_154] : memref<32x120xf32, #tpu.memory_space<vmem>>, vector<7x8xf32>
    tpu.vector_store %arg22[%c1_153, %c8_154], %166 {strides = array<i32>} : memref<32x120xf32, #tpu.memory_space<vmem>>, vector<7x8xf32>,
    %c0_155 = arith.constant 0 : index
    %c16_156 = arith.constant 16 : index
    %168 = vector.load %arg22[%c0_155, %c16_156] : memref<32x120xf32, #tpu.memory_space<vmem>>, vector<8x8xf32>
    tpu.vector_store %arg22[%c0_155, %c16_156], %131 {strides = array<i32>} : memref<32x120xf32, #tpu.memory_space<vmem>>, vector<8x8xf32>,
    %169 = vector.extract_strided_slice %131 {offsets = [1, 0], sizes = [7, 8], strides = [1, 1]} : vector<8x8xf32> to vector<7x8xf32>
    %c0_157 = arith.constant 0 : index
    %c24_158 = arith.constant 24 : index
    %170 = vector.load %arg22[%c0_157, %c24_158] : memref<32x120xf32, #tpu.memory_space<vmem>>, vector<7x8xf32>
    tpu.vector_store %arg22[%c0_157, %c24_158], %169 {strides = array<i32>} : memref<32x120xf32, #tpu.memory_space<vmem>>, vector<7x8xf32>,
    %171 = vector.extract_strided_slice %131 {offsets = [2, 0], sizes = [6, 8], strides = [1, 1]} : vector<8x8xf32> to vector<6x8xf32>
    %c0_159 = arith.constant 0 : index
    %c32_160 = arith.constant 32 : index
    %172 = vector.load %arg22[%c0_159, %c32_160] : memref<32x120xf32, #tpu.memory_space<vmem>>, vector<6x8xf32>
    tpu.vector_store %arg22[%c0_159, %c32_160], %171 {strides = array<i32>} : memref<32x120xf32, #tpu.memory_space<vmem>>, vector<6x8xf32>,
    %173 = vector.extract_strided_slice %132 {offsets = [0, 0], sizes = [6, 8], strides = [1, 1]} : vector<8x8xf32> to vector<6x8xf32>
    %c10_161 = arith.constant 10 : index
    %c0_162 = arith.constant 0 : index
    %174 = vector.load %arg22[%c10_161, %c0_162] : memref<32x120xf32, #tpu.memory_space<vmem>>, vector<6x8xf32>
    tpu.vector_store %arg22[%c10_161, %c0_162], %173 {strides = array<i32>} : memref<32x120xf32, #tpu.memory_space<vmem>>, vector<6x8xf32>,
    %175 = vector.extract_strided_slice %132 {offsets = [0, 0], sizes = [7, 8], strides = [1, 1]} : vector<8x8xf32> to vector<7x8xf32>
    %c9_163 = arith.constant 9 : index
    %c8_164 = arith.constant 8 : index
    %176 = vector.load %arg22[%c9_163, %c8_164] : memref<32x120xf32, #tpu.memory_space<vmem>>, vector<7x8xf32>
    tpu.vector_store %arg22[%c9_163, %c8_164], %175 {strides = array<i32>} : memref<32x120xf32, #tpu.memory_space<vmem>>, vector<7x8xf32>,
    %c8_165 = arith.constant 8 : index
    %c16_166 = arith.constant 16 : index
    %177 = vector.load %arg22[%c8_165, %c16_166] : memref<32x120xf32, #tpu.memory_space<vmem>>, vector<8x8xf32>
    tpu.vector_store %arg22[%c8_165, %c16_166], %132 {strides = array<i32>} : memref<32x120xf32, #tpu.memory_space<vmem>>, vector<8x8xf32>,
    %178 = vector.extract_strided_slice %132 {offsets = [1, 0], sizes = [7, 8], strides = [1, 1]} : vector<8x8xf32> to vector<7x8xf32>
    %c8_167 = arith.constant 8 : index
    %c24_168 = arith.constant 24 : index
    %179 = vector.load %arg22[%c8_167, %c24_168] : memref<32x120xf32, #tpu.memory_space<vmem>>, vector<7x8xf32>
    tpu.vector_store %arg22[%c8_167, %c24_168], %178 {strides = array<i32>} : memref<32x120xf32, #tpu.memory_space<vmem>>, vector<7x8xf32>,
    %180 = vector.extract_strided_slice %132 {offsets = [2, 0], sizes = [6, 8], strides = [1, 1]} : vector<8x8xf32> to vector<6x8xf32>
    %c8_169 = arith.constant 8 : index
    %c32_170 = arith.constant 32 : index
    %181 = vector.load %arg22[%c8_169, %c32_170] : memref<32x120xf32, #tpu.memory_space<vmem>>, vector<6x8xf32>
    tpu.vector_store %arg22[%c8_169, %c32_170], %180 {strides = array<i32>} : memref<32x120xf32, #tpu.memory_space<vmem>>, vector<6x8xf32>,
    %c0_171 = arith.constant 0 : index
    %c0_172 = arith.constant 0 : index
    %182 = vector.load %arg22[%c0_171, %c0_172] : memref<32x120xf32, #tpu.memory_space<vmem>>, vector<16x40xf32>
    %c0_173 = arith.constant 0 : index
    %c0_174 = arith.constant 0 : index
    %183 = vector.load %arg13[%c0_173, %c0_174] : memref<40x8xf32, #tpu.memory_space<vmem>>, vector<40x8xf32>
    %cst_175 = arith.constant dense<0.000000e+00> : vector<16x8xf32>
    %184 = tpu.matmul %182, %183, %cst_175 {dimension_numbers = #tpu.dot_dimension_numbers<[1], [0], [0], [1], [0, 0, 1, 1], [], []>} : vector<16x40xf32>, vector<40x8xf32>, vector<16x8xf32> -> vector<16x8xf32>
    %c0_176 = arith.constant 0 : index
    %c0_177 = arith.constant 0 : index
    %185 = vector.load %arg14[%c0_176, %c0_177] : memref<1x8xf32, #tpu.memory_space<vmem>>, vector<1x8xf32>
    %186 = vector.broadcast %185 : vector<1x8xf32> to vector<16x8xf32>
    %187 = arith.addf %184, %186 : vector<16x8xf32>
    %cst_178 = arith.constant 0.000000e+00 : f32
    %188 = vector.broadcast %cst_178 : f32 to vector<16x8xf32>
    %189 = arith.maximumf %187, %188 : vector<16x8xf32>
    %c0_179 = arith.constant 0 : index
    %c24_180 = arith.constant 24 : index
    %190 = vector.load %arg23[%c0_179, %c24_180] : memref<32x32xf32, #tpu.memory_space<vmem>>, vector<16x8xf32>
    tpu.vector_store %arg23[%c0_179, %c24_180], %189 {strides = array<i32>} : memref<32x32xf32, #tpu.memory_space<vmem>>, vector<16x8xf32>,
    %c0_181 = arith.constant 0 : index
    %c16_182 = arith.constant 16 : index
    %191 = vector.load %arg23[%c0_181, %c16_182] : memref<32x32xf32, #tpu.memory_space<vmem>>, vector<16x16xf32>
    %c0_183 = arith.constant 0 : index
    %c0_184 = arith.constant 0 : index
    %192 = vector.load %arg15[%c0_183, %c0_184] : memref<16x8xf32, #tpu.memory_space<vmem>>, vector<16x8xf32>
    %cst_185 = arith.constant dense<0.000000e+00> : vector<16x8xf32>
    %193 = tpu.matmul %191, %192, %cst_185 {dimension_numbers = #tpu.dot_dimension_numbers<[1], [0], [0], [1], [0, 0, 1, 1], [], []>} : vector<16x16xf32>, vector<16x8xf32>, vector<16x8xf32> -> vector<16x8xf32>
    %c0_186 = arith.constant 0 : index
    %c0_187 = arith.constant 0 : index
    %194 = vector.load %arg16[%c0_186, %c0_187] : memref<1x8xf32, #tpu.memory_space<vmem>>, vector<1x8xf32>
    %195 = vector.broadcast %194 : vector<1x8xf32> to vector<16x8xf32>
    %196 = arith.addf %193, %195 : vector<16x8xf32>
    %c0_188 = arith.constant 0 : index
    %c0_189 = arith.constant 0 : index
    %197 = vector.load %arg23[%c0_188, %c0_189] : memref<32x32xf32, #tpu.memory_space<vmem>>, vector<16x8xf32>
    tpu.vector_store %arg23[%c0_188, %c0_189], %196 {strides = array<i32>} : memref<32x32xf32, #tpu.memory_space<vmem>>, vector<16x8xf32>,
    %cst_190 = arith.constant 0.000000e+00 : f32
    %198 = vector.broadcast %cst_190 : f32 to vector<16x80xf32>
    %c0_191 = arith.constant 0 : index
    %c0_192 = arith.constant 0 : index
    %199 = vector.load %arg22[%c0_191, %c0_192] : memref<32x120xf32, #tpu.memory_space<vmem>>, vector<16x80xf32>
    tpu.vector_store %arg22[%c0_191, %c0_192], %198 {strides = array<i32>} : memref<32x120xf32, #tpu.memory_space<vmem>>, vector<16x80xf32>,
    %200 = vector.extract_strided_slice %127 {offsets = [0, 0], sizes = [6, 16], strides = [1, 1]} : vector<8x16xf32> to vector<6x16xf32>
    %c2_193 = arith.constant 2 : index
    %c0_194 = arith.constant 0 : index
    %201 = vector.load %arg22[%c2_193, %c0_194] : memref<32x120xf32, #tpu.memory_space<vmem>>, vector<6x16xf32>
    tpu.vector_store %arg22[%c2_193, %c0_194], %200 {strides = array<i32>} : memref<32x120xf32, #tpu.memory_space<vmem>>, vector<6x16xf32>,
    %202 = vector.extract_strided_slice %127 {offsets = [0, 0], sizes = [7, 16], strides = [1, 1]} : vector<8x16xf32> to vector<7x16xf32>
    %c1_195 = arith.constant 1 : index
    %c16_196 = arith.constant 16 : index
    %203 = vector.load %arg22[%c1_195, %c16_196] : memref<32x120xf32, #tpu.memory_space<vmem>>, vector<7x16xf32>
    tpu.vector_store %arg22[%c1_195, %c16_196], %202 {strides = array<i32>} : memref<32x120xf32, #tpu.memory_space<vmem>>, vector<7x16xf32>,
    %c0_197 = arith.constant 0 : index
    %c32_198 = arith.constant 32 : index
    %204 = vector.load %arg22[%c0_197, %c32_198] : memref<32x120xf32, #tpu.memory_space<vmem>>, vector<8x16xf32>
    tpu.vector_store %arg22[%c0_197, %c32_198], %127 {strides = array<i32>} : memref<32x120xf32, #tpu.memory_space<vmem>>, vector<8x16xf32>,
    %205 = vector.extract_strided_slice %127 {offsets = [1, 0], sizes = [7, 16], strides = [1, 1]} : vector<8x16xf32> to vector<7x16xf32>
    %c0_199 = arith.constant 0 : index
    %c48_200 = arith.constant 48 : index
    %206 = vector.load %arg22[%c0_199, %c48_200] : memref<32x120xf32, #tpu.memory_space<vmem>>, vector<7x16xf32>
    tpu.vector_store %arg22[%c0_199, %c48_200], %205 {strides = array<i32>} : memref<32x120xf32, #tpu.memory_space<vmem>>, vector<7x16xf32>,
    %207 = vector.extract_strided_slice %127 {offsets = [2, 0], sizes = [6, 16], strides = [1, 1]} : vector<8x16xf32> to vector<6x16xf32>
    %c0_201 = arith.constant 0 : index
    %c64_202 = arith.constant 64 : index
    %208 = vector.load %arg22[%c0_201, %c64_202] : memref<32x120xf32, #tpu.memory_space<vmem>>, vector<6x16xf32>
    tpu.vector_store %arg22[%c0_201, %c64_202], %207 {strides = array<i32>} : memref<32x120xf32, #tpu.memory_space<vmem>>, vector<6x16xf32>,
    %209 = vector.extract_strided_slice %128 {offsets = [0, 0], sizes = [6, 16], strides = [1, 1]} : vector<8x16xf32> to vector<6x16xf32>
    %c10_203 = arith.constant 10 : index
    %c0_204 = arith.constant 0 : index
    %210 = vector.load %arg22[%c10_203, %c0_204] : memref<32x120xf32, #tpu.memory_space<vmem>>, vector<6x16xf32>
    tpu.vector_store %arg22[%c10_203, %c0_204], %209 {strides = array<i32>} : memref<32x120xf32, #tpu.memory_space<vmem>>, vector<6x16xf32>,
    %211 = vector.extract_strided_slice %128 {offsets = [0, 0], sizes = [7, 16], strides = [1, 1]} : vector<8x16xf32> to vector<7x16xf32>
    %c9_205 = arith.constant 9 : index
    %c16_206 = arith.constant 16 : index
    %212 = vector.load %arg22[%c9_205, %c16_206] : memref<32x120xf32, #tpu.memory_space<vmem>>, vector<7x16xf32>
    tpu.vector_store %arg22[%c9_205, %c16_206], %211 {strides = array<i32>} : memref<32x120xf32, #tpu.memory_space<vmem>>, vector<7x16xf32>,
    %c8_207 = arith.constant 8 : index
    %c32_208 = arith.constant 32 : index
    %213 = vector.load %arg22[%c8_207, %c32_208] : memref<32x120xf32, #tpu.memory_space<vmem>>, vector<8x16xf32>
    tpu.vector_store %arg22[%c8_207, %c32_208], %128 {strides = array<i32>} : memref<32x120xf32, #tpu.memory_space<vmem>>, vector<8x16xf32>,
    %214 = vector.extract_strided_slice %128 {offsets = [1, 0], sizes = [7, 16], strides = [1, 1]} : vector<8x16xf32> to vector<7x16xf32>
    %c8_209 = arith.constant 8 : index
    %c48_210 = arith.constant 48 : index
    %215 = vector.load %arg22[%c8_209, %c48_210] : memref<32x120xf32, #tpu.memory_space<vmem>>, vector<7x16xf32>
    tpu.vector_store %arg22[%c8_209, %c48_210], %214 {strides = array<i32>} : memref<32x120xf32, #tpu.memory_space<vmem>>, vector<7x16xf32>,
    %216 = vector.extract_strided_slice %128 {offsets = [2, 0], sizes = [6, 16], strides = [1, 1]} : vector<8x16xf32> to vector<6x16xf32>
    %c8_211 = arith.constant 8 : index
    %c64_212 = arith.constant 64 : index
    %217 = vector.load %arg22[%c8_211, %c64_212] : memref<32x120xf32, #tpu.memory_space<vmem>>, vector<6x16xf32>
    tpu.vector_store %arg22[%c8_211, %c64_212], %216 {strides = array<i32>} : memref<32x120xf32, #tpu.memory_space<vmem>>, vector<6x16xf32>,
    %c0_213 = arith.constant 0 : index
    %c0_214 = arith.constant 0 : index
    %218 = vector.load %arg22[%c0_213, %c0_214] : memref<32x120xf32, #tpu.memory_space<vmem>>, vector<16x80xf32>
    %c0_215 = arith.constant 0 : index
    %c0_216 = arith.constant 0 : index
    %219 = vector.load %arg17[%c0_215, %c0_216] : memref<80x8xf32, #tpu.memory_space<vmem>>, vector<80x8xf32>
    %cst_217 = arith.constant dense<0.000000e+00> : vector<16x8xf32>
    %220 = tpu.matmul %218, %219, %cst_217 {dimension_numbers = #tpu.dot_dimension_numbers<[1], [0], [0], [1], [0, 0, 1, 1], [], []>} : vector<16x80xf32>, vector<80x8xf32>, vector<16x8xf32> -> vector<16x8xf32>
    %c0_218 = arith.constant 0 : index
    %c0_219 = arith.constant 0 : index
    %221 = vector.load %arg18[%c0_218, %c0_219] : memref<1x8xf32, #tpu.memory_space<vmem>>, vector<1x8xf32>
    %222 = vector.broadcast %221 : vector<1x8xf32> to vector<16x8xf32>
    %223 = arith.addf %220, %222 : vector<16x8xf32>
    %c0_220 = arith.constant 0 : index
    %c8_221 = arith.constant 8 : index
    %224 = vector.load %arg23[%c0_220, %c8_221] : memref<32x32xf32, #tpu.memory_space<vmem>>, vector<16x8xf32>
    tpu.vector_store %arg23[%c0_220, %c8_221], %223 {strides = array<i32>} : memref<32x32xf32, #tpu.memory_space<vmem>>, vector<16x8xf32>,
    %c0_222 = arith.constant 0 : index
    %c0_223 = arith.constant 0 : index
    %225 = vector.load %arg23[%c0_222, %c0_223] : memref<32x32xf32, #tpu.memory_space<vmem>>, vector<16x32xf32>
    %cst_224 = arith.constant 0.000000e+00 : f32
    %226 = vector.broadcast %cst_224 : f32 to vector<16x32xf32>
    %227 = arith.maximumf %225, %226 : vector<16x32xf32>
    %228 = tpu.iota {dimensions = array<i32: 0>} : vector<8x16xi32>
    %229 = tpu.iota {dimensions = array<i32: 1>} : vector<8x16xi32>
    %c2_i32_225 = arith.constant 2 : i32
    %230 = vector.broadcast %c2_i32_225 : i32 to vector<8x16xi32>
    %231 = arith.muli %230, %228 : vector<8x16xi32>
    %232 = arith.cmpi eq, %229, %231 : vector<8x16xi32>
    %233 = arith.extui %232 : vector<8x16xi1> to vector<8x16xi32>
    %234 = arith.sitofp %233 : vector<8x16xi32> to vector<8x16xf32>
    %c2_i32_226 = arith.constant 2 : i32
    %235 = vector.broadcast %c2_i32_226 : i32 to vector<8x16xi32>
    %236 = arith.muli %235, %228 : vector<8x16xi32>
    %c1_i32_227 = arith.constant 1 : i32
    %237 = vector.broadcast %c1_i32_227 : i32 to vector<8x16xi32>
    %238 = arith.addi %236, %237 : vector<8x16xi32>
    %239 = arith.cmpi eq, %229, %238 : vector<8x16xi32>
    %240 = arith.extui %239 : vector<8x16xi1> to vector<8x16xi32>
    %241 = arith.sitofp %240 : vector<8x16xi32> to vector<8x16xf32>
    %cst_228 = arith.constant dense<0.000000e+00> : vector<8x32xf32>
    %242 = tpu.matmul %234, %227, %cst_228 {dimension_numbers = #tpu.dot_dimension_numbers<[1], [0], [0], [1], [0, 0, 1, 1], [], []>} : vector<8x16xf32>, vector<16x32xf32>, vector<8x32xf32> -> vector<8x32xf32>
    %cst_229 = arith.constant dense<0.000000e+00> : vector<8x32xf32>
    %243 = tpu.matmul %241, %227, %cst_229 {dimension_numbers = #tpu.dot_dimension_numbers<[1], [0], [0], [1], [0, 0, 1, 1], [], []>} : vector<8x16xf32>, vector<16x32xf32>, vector<8x32xf32> -> vector<8x32xf32>
    %244 = arith.maximumf %242, %243 : vector<8x32xf32>
    %245 = vector.extract_strided_slice %244 {offsets = [0, 0], sizes = [8, 16], strides = [1, 1]} : vector<8x32xf32> to vector<8x16xf32>
    %246 = vector.extract_strided_slice %244 {offsets = [0, 16], sizes = [8, 8], strides = [1, 1]} : vector<8x32xf32> to vector<8x8xf32>
    %247 = vector.extract_strided_slice %244 {offsets = [0, 24], sizes = [8, 8], strides = [1, 1]} : vector<8x32xf32> to vector<8x8xf32>
    %c0_230 = arith.constant 0 : index
    %c0_231 = arith.constant 0 : index
    %248 = vector.load %arg19[%c0_230, %c0_231] : memref<8x16xf32, #tpu.memory_space<vmem>>, vector<8x16xf32>
    tpu.vector_store %arg19[%c0_230, %c0_231], %245 {strides = array<i32>} : memref<8x16xf32, #tpu.memory_space<vmem>>, vector<8x16xf32>,
    %c0_232 = arith.constant 0 : index
    %c0_233 = arith.constant 0 : index
    %249 = vector.load %arg20[%c0_232, %c0_233] : memref<8x8xf32, #tpu.memory_space<vmem>>, vector<8x8xf32>
    tpu.vector_store %arg20[%c0_232, %c0_233], %246 {strides = array<i32>} : memref<8x8xf32, #tpu.memory_space<vmem>>, vector<8x8xf32>,
    %c0_234 = arith.constant 0 : index
    %c0_235 = arith.constant 0 : index
    %250 = vector.load %arg21[%c0_234, %c0_235] : memref<8x8xf32, #tpu.memory_space<vmem>>, vector<8x8xf32>
    tpu.vector_store %arg21[%c0_234, %c0_235], %247 {strides = array<i32>} : memref<8x8xf32, #tpu.memory_space<vmem>>, vector<8x8xf32>,
    return
  }
}

</mosaic_0001>

<bundles_post_ra>
// kernel: tmc_forward.1
= control target key start
LH: loop header
LB: loop body
LE: loop exit
PB: predicated region body
PF: predicated region fallthrough
CT: control target
= control target key end

     0   :  { %s3061_s0 = inlined_call_operand.vmem [shape: f32[2,16,24], index: 0, kind: input, shape index: {}]   ;;  %s3062_s1 = inlined_call_operand.vmem [shape: f32[2,16,16], index: 1, kind: input, shape index: {}]   ;;  %s3063_s2 = inlined_call_operand.vmem [shape: f32[2,16,8], index: 2, kind: input, shape index: {}]   ;;  %s3064_s3 = inlined_call_operand.vmem [shape: f32[80,8], index: 3, kind: input, shape index: {}]   ;;  %s3065_s4 = inlined_call_operand.vmem [shape: f32[1,8], index: 4, kind: input, shape index: {}]   ;;  %s3066_s5 = inlined_call_operand.vmem [shape: f32[40,8], index: 5, kind: input, shape index: {}]   ;;  %s3067_s6 = inlined_call_operand.vmem [shape: f32[1,8], index: 6, kind: input, shape index: {}]   ;;  %s3068_s7 = inlined_call_operand.vmem [shape: f32[16,8], index: 7, kind: input, shape index: {}]   ;;  %s3069_s8 = inlined_call_operand.vmem [shape: f32[1,8], index: 8, kind: input, shape index: {}]   ;;  %s3070_s9 = inlined_call_operand.vmem [shape: f32[120,8], index: 9, kind: input, shape index: {}]   ;;  %s3071_s10 = inlined_call_operand.vmem [shape: f32[1,8], index: 10, kind: input, shape index: {}]   ;;  %s3072_s11 = inlined_call_operand.vmem [shape: f32[40,8], index: 11, kind: input, shape index: {}]   ;;  %s3073_s12 = inlined_call_operand.vmem [shape: f32[1,8], index: 12, kind: input, shape index: {}]   ;;  %s3074_s13 = inlined_call_operand.vmem [shape: f32[40,8], index: 13, kind: input, shape index: {}]   ;;  %s3075_s14 = inlined_call_operand.vmem [shape: f32[1,8], index: 14, kind: input, shape index: {}]   ;;  %s3076_s15 = inlined_call_operand.vmem [shape: f32[16,8], index: 15, kind: input, shape index: {}]   ;;  %s3077_s16 = inlined_call_operand.vmem [shape: f32[1,8], index: 16, kind: input, shape index: {}]   ;;  %s3078_s17 = inlined_call_operand.vmem [shape: f32[80,8], index: 17, kind: input, shape index: {}]   ;;  %s3079_s18 = inlined_call_operand.vmem [shape: f32[1,8], index: 18, kind: input, shape index: {}]   ;;  %s3080_s19 = inlined_call_operand.hbm [shape: f32[8,16], index: 19, kind: output, shape index: {0}]   ;;  %s3081_s20 = inlined_call_operand.hbm [shape: f32[8,8], index: 20, kind: output, shape index: {1}]   ;;  %s3082_s21 = inlined_call_operand.hbm [shape: f32[8,8], index: 21, kind: output, shape index: {2}]  }
   0x1   :  { %3096 = sst [smem:[#allocation11_spill]] %s3061_s0 }
   0x2   :  { %3097 = sst [smem:[#allocation12_spill]] %s3062_s1 }
   0x3   :  { %3098 = sst [smem:[#allocation13_spill]] %s3063_s2 }
   0x4   :  { %3099 = sst [smem:[#allocation14_spill]] %s3064_s3 }
   0x5   :  { %3100 = sst [smem:[#allocation15_spill]] %s3065_s4 }
   0x6   :  { %3101 = sst [smem:[#allocation16_spill]] %s3066_s5 }
   0x7   :  { %27 = vsyncpa [#allocation5], 0  ;;  %s3102_s26 = sld [smem:[#allocation12_spill]]  ;;  %vm3091_vm0 = vcmask 654336   ;;  %s2319_s27 = smov 32   ;;  %vm3089_vm1 = vcmask 130048  }
   0x8   :  { %s2320_s3 = smov 16   ;;  %v2321_v4 = vmov 0.0   ;;  %s3103_s1 = sld [smem:[#allocation14_spill]]  ;;  %vm3088_vm2 = vcmask 128000  }
   0x9   :  { %83 = vst.msk [vmem:[#allocation2] sm:$0xff] %vm3091_vm0, %v2321_v4  ;;  %84 = vst.msk [vmem:[#allocation2 + $0x8] sm:$0xff] %vm3091_vm0, %v2321_v4 }
   0xa   :  { %85 = vst.msk [vmem:[#allocation2 + $0x10] sm:$0xff] %vm3091_vm0, %v2321_v4  ;;  %86 = vst.msk [vmem:[#allocation2 + $0x18] sm:$0xff] %vm3091_vm0, %v2321_v4 }
   0xd   :  { %v72_v0 = vld [vmem:[%s3102_s26] sm:$0xff]  ;;  %v73_v1 = vld [vmem:[%s3102_s26 + $0x8] sm:$0xff]  ;;  %v2457_v2 = vld [vmem:[%s3102_s26 + $0x18] sm:$0xff] }
   0xe   :  { %103 = vrot.lane.b32.xlu1 %v72_v0, %s2319_s27  ;;  %93 = vrot.lane.b32.xlu0 %v72_v0, %s2320_s3  ;;  %v2462_v3 = vld [vmem:[%s3102_s26 + $0x10] sm:$0xff]  ;;  %88 = vst.msk [vmem:[#allocation2 + $0x2] sm:$0xff] %vm3089_vm1, %v72_v0  ;;  %v172_v5 = vld [vmem:[%s3103_s1] sm:$0xff] }
   0xf   :  { %v173_v6 = vld [vmem:[%s3103_s1 + $0x8] sm:$0xff]  ;;  %132 = vst.msk [vmem:[#allocation2 + $0x12] sm:$0xff] %vm3089_vm1, %v2462_v3  ;;  %v174_v7 = vld [vmem:[%s3103_s1 + $0x10] sm:$0xff]  ;;  %v175_v9 = vld [vmem:[%s3103_s1 + $0x18] sm:$0xff] }
  0x10   :  { %v2110_v8 = vpack.c.bf16 %v173_v6, %v172_v5  ;;  %90 = vst.msk [vmem:[#allocation2 + $0xa] sm:$0x3f] %vm3088_vm2, %v73_v1  ;;  %133 = vst.msk [vmem:[#allocation2 + $0x1a] sm:$0x3f] %vm3088_vm2, %v2457_v2  ;;  %v2114_v10 = vpack.c.bf16 %v175_v9, %v174_v7  ;;  %v176_v11 = vld [vmem:[%s3103_s1 + $0x20] sm:$0xff]  ;;  %v177_v12 = vld [vmem:[%s3103_s1 + $0x28] sm:$0xff] }
  0x12   :  { %105 = vrot.lane.b32.xlu1 %v73_v1, %s2319_s27  ;;  %95 = vrot.lane.b32.xlu0 %v73_v1, %s2320_s3 }
  0x13   :  { %2111 = vmatprep.subr.bf16.mxu0 %v2110_v8 }
  0x14   :  { %28 = vsyncpa [#allocation7], 0  ;;  %2113 = vmatpush3.bf16.msra.mxu0 %v2110_v8  ;;  %v2118_v13 = vpack.c.bf16 %v177_v12, %v176_v11  ;;  %s2322_s22 = smov 48   ;;  %v178_v14 = vld [vmem:[%s3103_s1 + $0x30] sm:$0xff]  ;;  %v179_v15 = vld [vmem:[%s3103_s1 + $0x38] sm:$0xff]  ;;  %s3104_s29 = sld [smem:[#allocation16_spill]] }
  0x15   :  { %2115 = vmatprep.subr.bf16.mxu0 %v2114_v10  ;;  %v2122_v16 = vpack.c.bf16 %v179_v15, %v178_v14  ;;  %s2323_s30 = smov 64   ;;  %v180_v19 = vld [vmem:[%s3103_s1 + $0x40] sm:$0xff]  ;;  %v181_v20 = vld [vmem:[%s3103_s1 + $0x48] sm:$0xff]  ;;  %s3105_s28 = sld [smem:[#allocation13_spill]]  ;;  %vm99_vm3 = vcmask 261248   ;;  %vm109_vm4 = vcmask 392448  }
  0x16   :  { %114 = vrot.lane.b32.xlu1 %v73_v1, %s2322_s22  ;;  %112 = vrot.lane.b32.xlu0 %v72_v0, %s2322_s22  ;;  %v2126_v24 = vpack.c.bf16 %v181_v20, %v180_v19  ;;  %s2324_s2 = smov 8   ;;  %s2325_s0 = smov 24   ;;  %vm101_vm5 = vcmask 260224   ;;  %vm120_vm6 = vcmask 523648   ;;  %vm3094_vm7 = vcmask 523649  }
  0x17   :  { %vm130_vm8 = vcmask 654848   ;;  %vm3093_vm9 = vcmask 654850   ;;  %vm311_vm10 = vcmask 326656   ;;  %vm3090_vm11 = vcmask 64512   ;;  %s3111_s24 = sld [smem:[#allocation15_spill]]  ;;  %s3112_s4 = sld [smem:[#allocation11_spill]] }
  0x18   :  { %2117 = vmatpush3.bf16.msra.mxu0 %v2114_v10  ;;  %vm318_vm12 = vcmask 62464   ;;  %vm328_vm13 = vcmask 130112   ;;  %vm330_vm14 = vcmask 129088   ;;  %vm3092_vm15 = vcmask 195712   ;;  %v1797_v15 = vld [vmem:[%s3067_s6] ss:$0 sm:$0xff] }
  0x19   :  { %2119 = vmatprep.subr.bf16.mxu0 %v2118_v13  ;;  %vm3095_vm2 = vcmask 261312   ;;  %vm346_vm1 = vcmask 261313   ;;  %s2326_s1 = smov 112   ;;  %s2328_s25 = smov 96  }
  0x1a   :  { %v400_v17 = vld [vmem:[%s3104_s29] sm:$0xff]  ;;  %v401_v18 = vld [vmem:[%s3104_s29 + $0x8] sm:$0xff]  ;;  %124 = vrot.lane.b32.xlu1 %v73_v1, %s2323_s30  ;;  %122 = vrot.lane.b32.xlu0 %v72_v0, %s2323_s30 }
  0x1b   :  { %v2130_v21 = vpack.c.bf16 %v401_v18, %v400_v17  ;;  %v2523_v22 = vld [vmem:[%s3105_s28 + $0x8] sm:$0xff]  ;;  %v2528_v23 = vld [vmem:[%s3105_s28] sm:$0xff]  ;;  %v402_v25 = vld [vmem:[%s3104_s29 + $0x10] sm:$0xff] }
  0x1c   :  { %2121 = vmatpush3.bf16.msra.mxu0 %v2118_v13  ;;  %v403_v26 = vld [vmem:[%s3104_s29 + $0x18] sm:$0xff]  ;;  %v404_v28 = vld [vmem:[%s3104_s29 + $0x20] sm:$0xff]  ;;  %v2579_v30 = vld [vmem:[%s3105_s28 + $0x10] sm:$0xff] }
  0x1d   :  { %2131 = vmatprep.subr.bf16.mxu1 %v2130_v21  ;;  %2123 = vmatprep.subr.bf16.mxu0 %v2122_v16  ;;  %v2134_v27 = vpack.c.bf16 %v403_v26, %v402_v25  ;;  %v2574_v29 = vld [vmem:[%s3105_s28 + $0x18] sm:$0xff]  ;;  %v1792_v8 = vld [vmem:[%s3111_s24] ss:$0 sm:$0xff]  ;;  %s2327_s24 = smov 72  }
  0x1e   :  { %2133 = vmatpush3.bf16.msra.mxu1 %v2130_v21  ;;  %324 = vrot.lane.b32.xlu1 %v2523_v22, %s2324_s2 }
  0x1f   :  { %322 = vrot.lane.b32.xlu0 %v2528_v23, %s2324_s2  ;;  %2135 = vmatprep.subr.bf16.mxu1 %v2134_v27 }
  0x20   :  { %2125 = vmatpush3.bf16.msra.mxu0 %v2122_v16 }
  0x21   :  { %2127 = vmatprep.subr.bf16.mxu0 %v2126_v24 }
  0x22   :  { %2137 = vmatpush3.bf16.msra.mxu1 %v2134_v27  ;;  %334 = vrot.lane.b32.xlu1 %v2523_v22, %s2320_s3 }
  0x23   :  { %332 = vrot.lane.b32.xlu0 %v2528_v23, %s2320_s3  ;;  %1964 = vmatprep.subr.mxu1 %v404_v28 }
  0x24   :  { %2129 = vmatpush3.bf16.msra.mxu0 %v2126_v24 }
  0x26   :  { %1965 = vmatpush3.msra.mxu1 %v404_v28  ;;  %342 = vrot.lane.b32.xlu1 %v2523_v22, %s2325_s0 }
  0x27   :  { %340 = vrot.lane.b32.xlu0 %v2528_v23, %s2325_s0 }
  0x2a   :  { %352 = vrot.lane.b32.xlu1 %v2523_v22, %s2319_s27 }
  0x2b   :  { %350 = vrot.lane.b32.xlu0 %v2528_v23, %s2319_s27 }
  0x2e   :  { %138 = vrot.lane.b32.xlu1 %v2457_v2, %s2320_s3 }
  0x2f   :  { %136 = vrot.lane.b32.xlu0 %v2462_v3, %s2320_s3 }
  0x32   :  { %146 = vrot.lane.b32.xlu1 %v2457_v2, %s2319_s27 }
  0x33   :  { %144 = vrot.lane.b32.xlu0 %v2462_v3, %s2319_s27 }
  0x36   :  { %154 = vrot.lane.b32.xlu1 %v2457_v2, %s2322_s22 }
  0x37   :  { %152 = vrot.lane.b32.xlu0 %v2462_v3, %s2322_s22 }
  0x3a   :  { %162 = vrot.lane.b32.xlu1 %v2457_v2, %s2323_s30 }
  0x3b   :  { %160 = vrot.lane.b32.xlu0 %v2462_v3, %s2323_s30 }
  0x3e   :  { %366 = vrot.lane.b32.xlu1 %v2574_v29, %s2324_s2 }
  0x3f   :  { %364 = vrot.lane.b32.xlu0 %v2579_v30, %s2324_s2 }
  0x42   :  { %374 = vrot.lane.b32.xlu1 %v2574_v29, %s2320_s3 }
  0x43   :  { %372 = vrot.lane.b32.xlu0 %v2579_v30, %s2320_s3 }
  0x46   :  { %382 = vrot.lane.b32.xlu1 %v2574_v29, %s2325_s0 }
  0x47   :  { %380 = vrot.lane.b32.xlu0 %v2579_v30, %s2325_s0 }
  0x4a   :  { %390 = vrot.lane.b32.xlu1 %v2574_v29, %s2319_s27 }
  0x4b   :  { %388 = vrot.lane.b32.xlu0 %v2579_v30, %s2319_s27 }
  0x80   :  { %v104_v31 = vpop.permute.xlu1 %103  ;;  %v94_v32 = vpop.permute.xlu0 %93 }
  0x81   :  { %100 = vst.msk [vmem:[#allocation2 + $0x1] sm:$0xff] %vm99_vm3, %v94_v32 }
  0x82   :  { %110 = vst.msk [vmem:[#allocation2] sm:$0xff] %vm109_vm4, %v104_v31 }
  0x84   :  { %v106_v33 = vpop.permute.xlu1 %105  ;;  %v96_v34 = vpop.permute.xlu0 %95 }
  0x85   :  { %102 = vst.msk [vmem:[#allocation2 + $0x9] sm:$0x7f] %vm101_vm5, %v96_v34  ;;  %v68_v34 = vld [vmem:[%s3112_s4 + $0x8] sm:$0xff] }
  0x86   :  { %111 = vst.msk [vmem:[#allocation2 + $0x8] sm:$0xff] %vm109_vm4, %v106_v33 }
  0x88   :  { %v115_v35 = vpop.permute.xlu1 %114  ;;  %v113_v36 = vpop.permute.xlu0 %112 }
  0x89   :  { %121 = vst.msk [vmem:[#allocation2 + $0x7] sm:$0xff] %vm120_vm6, %v115_v35  ;;  %v67_v35 = vld [vmem:[%s3112_s4] sm:$0xff] }
  0x8a   :  { %119 = vst.msk [vmem:[#allocation2 - $0x1] sm:$0xfe] %vm3094_vm7, %v113_v36  ;;  %v2682_v36 = vld [vmem:[%s3112_s4 + $0x18] sm:$0xff] }
  0x8c   :  { %v125_v37 = vpop.permute.xlu1 %124  ;;  %v123_v38 = vpop.permute.xlu0 %122 }
  0x8d   :  { %131 = vst.msk [vmem:[#allocation2 + $0x6] sm:$0xff] %vm130_vm8, %v125_v37  ;;  %v1786_v37 = vld [vmem:[%s3112_s4 + $0x10] sm:$0xff]  ;;  %s2329_s4 = smov 120  }
  0x8e   :  { %129 = vst.msk [vmem:[#allocation2 - $0x2] sm:$0xfc] %vm3093_vm9, %v123_v38  ;;  %v537_v38 = vld [vmem:[%s3068_s7] sm:$0xff] }
  0x90   :  { %v325_v39 = vpop.permute.xlu1 %324 }
  0x91   :  { %v323_v40 = vpop.permute.xlu0 %322 }
  0x94   :  { %v335_v41 = vpop.permute.xlu1 %334  ;;  %v169_v44 = vld [vmem:[#allocation2 + $0x8] sm:$0xff] }
  0x95   :  { %v333_v42 = vpop.permute.xlu0 %332  ;;  %v168_v43 = vld [vmem:[#allocation2] sm:$0xff]  ;;  %313 = vst.msk [vmem:[#allocation2 + $0x8] sm:$0xff] %vm311_vm10, %v2321_v4 }
  0x96   :  { %1950 = vmatprep.mubr.msk.f32.mxu0 %vm3091_vm0, %v168_v43  ;;  %312 = vst.msk [vmem:[#allocation2] sm:$0xff] %vm311_vm10, %v2321_v4 }
  0x97   :  { %317 = vst.msk [vmem:[#allocation2 + $0x2] sm:$0xff] %vm3090_vm11, %v2528_v23  ;;  %1951 = vmatmul.mubr.msk.f32.vlgmr.msra.gmra.mrb[0].mxu0 %vm3091_vm0, %v169_v44  ;;  %vm358_vm11 = vcmask 326912   ;;  %vm356_vm0 = vcmask 326914  }
  0x98   :  { %319 = vst.msk [vmem:[#allocation2 + $0xa] sm:$0x3f] %vm318_vm12, %v2523_v22  ;;  %v343_v45 = vpop.permute.xlu1 %342 }
  0x99   :  { %329 = vst.msk [vmem:[#allocation2 + $0x1] sm:$0xff] %vm328_vm13, %v323_v40  ;;  %v341_v46 = vpop.permute.xlu0 %340 }
  0x9a   :  { %331 = vst.msk [vmem:[#allocation2 + $0x9] sm:$0x7f] %vm330_vm14, %v325_v39  ;;  %v538_v39 = vld [vmem:[%s3068_s7 + $0x8] sm:$0xff] }
  0x9b   :  { %338 = vst.msk [vmem:[#allocation2] sm:$0xff] %vm3092_vm15, %v333_v42  ;;  %339 = vst.msk [vmem:[#allocation2 + $0x8] sm:$0xff] %vm3092_vm15, %v335_v41  ;;  %vm655_vm15 = vcmask 982016   ;;  %v2138_v40 = vpack.c.bf16 %v538_v39, %v537_v38 }
  0x9c   :  { %349 = vst.msk [vmem:[#allocation2 + $0x7] sm:$0xff] %vm3095_vm2, %v343_v45  ;;  %v353_v47 = vpop.permute.xlu1 %352  ;;  %v745_v45 = vld [vmem:[%s3070_s9] sm:$0xff] }
  0x9d   :  { %347 = vst.msk [vmem:[#allocation2 - $0x1] sm:$0xfe] %vm346_vm1, %v341_v46  ;;  %v351_v48 = vpop.permute.xlu0 %350  ;;  %2139 = vmatprep.subr.bf16.mxu1 %v2138_v40  ;;  %v746_v46 = vld [vmem:[%s3070_s9 + $0x8] sm:$0xff] }
  0x9e   :  { %359 = vst.msk [vmem:[#allocation2 + $0x6] sm:$0xff] %vm358_vm11, %v353_v47  ;;  %v2142_v47 = vpack.c.bf16 %v746_v46, %v745_v45  ;;  %v1807_v45 = vld [vmem:[%s3071_s10] ss:$0 sm:$0xff] }
  0x9f   :  { %357 = vst.msk [vmem:[#allocation2 - $0x2] sm:$0xfc] %vm356_vm0, %v351_v48 }
  0xa0   :  { %v139_v49 = vpop.permute.xlu1 %138 }
  0xa1   :  { %v137_v50 = vpop.permute.xlu0 %136  ;;  %143 = vst.msk [vmem:[#allocation2 + $0x19] sm:$0x7f] %vm101_vm5, %v139_v49 }
  0xa2   :  { %142 = vst.msk [vmem:[#allocation2 + $0x11] sm:$0xff] %vm99_vm3, %v137_v50  ;;  %vm3106_vm3 = vcmask 654336  }
  0xa4   :  { %v147_v51 = vpop.permute.xlu1 %146 }
  0xa5   :  { %v145_v52 = vpop.permute.xlu0 %144  ;;  %v397_v54 = vld [vmem:[#allocation2 + $0x8] sm:$0xff]  ;;  %151 = vst.msk [vmem:[#allocation2 + $0x18] sm:$0xff] %vm109_vm4, %v147_v51 }
  0xa6   :  { %v396_v53 = vld [vmem:[#allocation2] sm:$0xff]  ;;  %150 = vst.msk [vmem:[#allocation2 + $0x10] sm:$0xff] %vm109_vm4, %v145_v52 }
  0xa7   :  { %1966 = vmatprep.mubr.msk.f32.mxu1 %vm311_vm10, %v396_v53  ;;  %656 = vst.msk [vmem:[#allocation2] sm:$0xff] %vm655_vm15, %v2321_v4  ;;  %657 = vst.msk [vmem:[#allocation2 + $0x8] sm:$0xff] %vm655_vm15, %v2321_v4 }
  0xa8   :  { %1967 = vmatmul.mubr.msk.f32.vlgmr.msra.gmra.mrb[0].mxu1 %vm311_vm10, %v397_v54  ;;  %v155_v55 = vpop.permute.xlu1 %154 }
  0xa9   :  { %v153_v56 = vpop.permute.xlu0 %152  ;;  %159 = vst.msk [vmem:[#allocation2 + $0x17] sm:$0xff] %vm120_vm6, %v155_v55  ;;  %vm3107_vm6 = vcmask 64512   ;;  %2141 = vmatpush3.bf16.msra.mxu1 %v2138_v40 }
  0xaa   :  { %158 = vst.msk [vmem:[#allocation2 + $0xf] sm:$0xfe] %vm3094_vm7, %v153_v56  ;;  %2143 = vmatprep.subr.bf16.mxu1 %v2142_v47 }
  0xac   :  { %v163_v57 = vpop.permute.xlu1 %162 }
  0xad   :  { %v161_v58 = vpop.permute.xlu0 %160  ;;  %167 = vst.msk [vmem:[#allocation2 + $0x16] sm:$0xff] %vm130_vm8, %v163_v57  ;;  %vm3108_vm8 = vmmov %vm3106_vm3 }
  0xae   :  { %166 = vst.msk [vmem:[#allocation2 + $0xe] sm:$0xfc] %vm3093_vm9, %v161_v58  ;;  %vm3109_vm9 = vcmask 195712  }
  0xaf   :  { %vm3110_vm7 = vmmov %vm3109_vm9 }
  0xb0   :  { %v367_v59 = vpop.permute.xlu1 %366 }
  0xb1   :  { %v365_v60 = vpop.permute.xlu0 %364 }
  0xb4   :  { %v171_v62 = vld [vmem:[#allocation2 + $0x18] sm:$0xff]  ;;  %v375_v63 = vpop.permute.xlu1 %374 }
  0xb5   :  { %v170_v61 = vld [vmem:[#allocation2 + $0x10] sm:$0xff]  ;;  %v373_v0 = vpop.permute.xlu0 %372  ;;  %315 = vst.msk [vmem:[#allocation2 + $0x18] sm:$0xff] %vm311_vm10, %v2321_v4 }
  0xb6   :  { %314 = vst.msk [vmem:[#allocation2 + $0x10] sm:$0xff] %vm311_vm10, %v2321_v4  ;;  %1953 = vmatprep.mubr.msk.f32.mxu0 %vm3106_vm3, %v170_v61  ;;  %v748_v61 = vld [vmem:[%s3070_s9 + $0x18] sm:$0xff] }
  0xb7   :  { %360 = vst.msk [vmem:[#allocation2 + $0x12] sm:$0xff] %vm3107_vm6, %v2579_v30  ;;  %1954 = vmatmul.mubr.msk.f32.gmra.mrb[2].mxu0 %vm3108_vm8, %v171_v62 }
  0xb8   :  { %361 = vst.msk [vmem:[#allocation2 + $0x1a] sm:$0x3f] %vm318_vm12, %v2574_v29  ;;  %v383_v1 = vpop.permute.xlu1 %382 }
  0xb9   :  { %371 = vst.msk [vmem:[#allocation2 + $0x19] sm:$0x7f] %vm330_vm14, %v367_v59  ;;  %v381_v2 = vpop.permute.xlu0 %380 }
  0xba   :  { %370 = vst.msk [vmem:[#allocation2 + $0x11] sm:$0xff] %vm328_vm13, %v365_v60  ;;  %v747_v60 = vld [vmem:[%s3070_s9 + $0x10] sm:$0xff] }
  0xbb   :  { %379 = vst.msk [vmem:[#allocation2 + $0x18] sm:$0xff] %vm3109_vm9, %v375_v63  ;;  %vm662_vm9 = vcmask 193536  }
  0xbc   :  { %378 = vst.msk [vmem:[#allocation2 + $0x10] sm:$0xff] %vm3110_vm7, %v373_v0  ;;  %v391_v3 = vpop.permute.xlu1 %390  ;;  %vm660_vm7 = vcmask 195584   ;;  %v2146_v0 = vpack.c.bf16 %v748_v61, %v747_v60 }
  0xbd   :  { %387 = vst.msk [vmem:[#allocation2 + $0x17] sm:$0xff] %vm3095_vm2, %v383_v1  ;;  %v389_v5 = vpop.permute.xlu0 %388  ;;  %v749_v1 = vld [vmem:[%s3070_s9 + $0x20] sm:$0xff] }
  0xbe   :  { %386 = vst.msk [vmem:[#allocation2 + $0xf] sm:$0xfe] %vm346_vm1, %v381_v2  ;;  %v750_v2 = vld [vmem:[%s3070_s9 + $0x28] sm:$0xff] }
  0xbf   :  { %395 = vst.msk [vmem:[#allocation2 + $0x16] sm:$0xff] %vm358_vm11, %v391_v3  ;;  %vm3113_vm11 = vcmask 195712  }
  0xc0   :  { %394 = vst.msk [vmem:[#allocation2 + $0xe] sm:$0xfc] %vm356_vm0, %v389_v5  ;;  %vm3114_vm3 = vmmov %vm3113_vm11 }
  0xc1   :  { %661 = vst.msk [vmem:[#allocation2 + $0x2] sm:$0xff] %vm660_vm7, %v67_v35  ;;  %vm3115_vm6 = vmmov %vm3114_vm3 }
  0xc2   :  { %663 = vst.msk [vmem:[#allocation2 + $0xa] sm:$0x3f] %vm662_vm9, %v68_v34  ;;  %vm3116_vm8 = vmmov %vm3114_vm3 }
  0xc6   :  { %v399_v7 = vld [vmem:[#allocation2 + $0x18] sm:$0xff] }
  0xc7   :  { %v398_v6 = vld [vmem:[#allocation2 + $0x10] sm:$0xff]  ;;  %659 = vst.msk [vmem:[#allocation2 + $0x18] sm:$0xff] %vm655_vm15, %v2321_v4 }
  0xc8   :  { %1969 = vmatprep.mubr.msk.f32.mxu1 %vm311_vm10, %v398_v6  ;;  %658 = vst.msk [vmem:[#allocation2 + $0x10] sm:$0xff] %vm655_vm15, %v2321_v4  ;;  %v2150_v6 = vpack.c.bf16 %v750_v2, %v749_v1 }
  0xc9   :  { %1970 = vmatmul.mubr.msk.f32.gmra.mrb[2].mxu1 %vm311_vm10, %v399_v7  ;;  %705 = vst.msk [vmem:[#allocation2 + $0x12] sm:$0xff] %vm660_vm7, %v1786_v37  ;;  %vm674_vm7 = vcmask 391360   ;;  %v751_v7 = vld [vmem:[%s3070_s9 + $0x30] sm:$0xff] }
  0xca   :  { %706 = vst.msk [vmem:[#allocation2 + $0x1a] sm:$0x3f] %vm662_vm9, %v2682_v36  ;;  %vm672_vm9 = vcmask 392384  }
 0x16a   :  { %v1952_v9 = vpop.f32.mrb[0].mxu0 }
 0x16b   :  { %v273_v10 = vadd.f32 %v1952_v9, %v1792_v8  ;;  %v267_v11 = vpop.f32.mrb[1].mxu0 }
 0x16c   :  { %v268_v12 = vadd.f32 %v1792_v8, %v267_v11 }
 0x16d   :  { %v287_v13 = vmax.f32 %v273_v10, 0.0 }
 0x16e   :  { %v286_v14 = vmax.f32 %v268_v12, 0.0  ;;  %v753_v12 = vld [vmem:[%s3070_s9 + $0x40] sm:$0xff] }
 0x16f   :  { %296 = vrot.lane.b32.xlu1 %v287_v13, %s2320_s3  ;;  %v754_v13 = vld [vmem:[%s3070_s9 + $0x48] sm:$0xff] }
 0x170   :  { %294 = vrot.lane.b32.xlu0 %v286_v14, %s2320_s3 }
 0x17b   :  { %v1968_v16 = vpop.f32.mrb[0].mxu1 }
 0x17c   :  { %v496_v17 = vadd.f32 %v1968_v16, %v1797_v15  ;;  %v490_v18 = vpop.f32.mrb[1].mxu1  ;;  %v2158_v16 = vpack.c.bf16 %v754_v13, %v753_v12 }
 0x17d   :  { %v491_v19 = vadd.f32 %v1797_v15, %v490_v18  ;;  %v756_v18 = vld [vmem:[%s3070_s9 + $0x58] sm:$0xff] }
 0x17e   :  { %v510_v20 = vmax.f32 %v496_v17, 0.0  ;;  %v755_v17 = vld [vmem:[%s3070_s9 + $0x50] sm:$0xff] }
 0x17f   :  { %v509_v21 = vmax.f32 %v491_v19, 0.0 }
 0x180   :  { %519 = vrot.lane.b32.xlu1 %v510_v20, %s2325_s0 }
 0x181   :  { %517 = vrot.lane.b32.xlu0 %v509_v21, %s2325_s0 }
 0x18a   :  { %v1955_v22 = vpop.f32.mrb[2].mxu0 }
 0x18b   :  { %v283_v23 = vadd.f32 %v1955_v22, %v1792_v8  ;;  %v277_v24 = vpop.f32.mrb[3].mxu0  ;;  %v2162_v22 = vpack.c.bf16 %v756_v18, %v755_v17  ;;  %v1118_v18 = vld [vmem:[%s3072_s11] sm:$0xff] }
 0x18c   :  { %v278_v25 = vadd.f32 %v1792_v8, %v277_v24  ;;  %v752_v8 = vld [vmem:[%s3070_s9 + $0x38] sm:$0xff]  ;;  %v757_v24 = vld [vmem:[%s3070_s9 + $0x60] sm:$0xff] }
 0x18d   :  { %v289_v26 = vmax.f32 %v283_v23, 0.0  ;;  %v2154_v11 = vpack.c.bf16 %v752_v8, %v751_v7 }
 0x18e   :  { %v288_v27 = vmax.f32 %v278_v25, 0.0  ;;  %v758_v25 = vld [vmem:[%s3070_s9 + $0x68] sm:$0xff] }
 0x18f   :  { %300 = vrot.lane.b32.xlu1 %v289_v26, %s2320_s3 }
 0x190   :  { %298 = vrot.lane.b32.xlu0 %v288_v27, %s2320_s3 }
 0x19c   :  { %v1971_v28 = vpop.f32.mrb[2].mxu1 }
 0x19d   :  { %v506_v29 = vadd.f32 %v1971_v28, %v1797_v15  ;;  %v500_v30 = vpop.f32.mrb[3].mxu1  ;;  %v2166_v28 = vpack.c.bf16 %v758_v25, %v757_v24 }
 0x19e   :  { %v501_v31 = vadd.f32 %v1797_v15, %v500_v30  ;;  %v759_v30 = vld [vmem:[%s3070_s9 + $0x70] sm:$0xff] }
 0x19f   :  { %v512_v32 = vmax.f32 %v506_v29, 0.0 }
 0x1a0   :  { %v511_v33 = vmax.f32 %v501_v31, 0.0 }
 0x1a1   :  { %523 = vrot.lane.b32.xlu1 %v512_v32, %s2325_s0 }
 0x1a2   :  { %521 = vrot.lane.b32.xlu0 %v511_v33, %s2325_s0 }
 0x1a5   :  { %668 = vrot.lane.b32.xlu1 %v68_v34, %s2325_s0 }
 0x1a6   :  { %666 = vrot.lane.b32.xlu0 %v67_v35, %s2325_s0 }
 0x1a9   :  { %678 = vrot.lane.b32.xlu1 %v68_v34, %s2322_s22 }
 0x1aa   :  { %676 = vrot.lane.b32.xlu0 %v67_v35, %s2322_s22 }
 0x1e1   :  { %v297_v41 = vpop.permute.xlu1 %296 }
 0x1e2   :  { %308 = vst.msk [vmem:[#allocation3 + $0x8] sm:$0xff] %vm3113_vm11, %v297_v41  ;;  %v295_v42 = vpop.permute.xlu0 %294  ;;  %vm682_vm11 = vcmask 589184  }
 0x1e3   :  { %307 = vst.msk [vmem:[#allocation3] sm:$0xff] %vm3114_vm3, %v295_v42  ;;  %vm3117_vm3 = vcmask 130048  }
 0x1f2   :  { %v520_v43 = vpop.permute.xlu1 %519 }
 0x1f3   :  { %530 = vst.msk [vmem:[#allocation3 + $0x8] sm:$0xff] %vm3095_vm2, %v520_v43  ;;  %v518_v44 = vpop.permute.xlu0 %517 }
 0x1f4   :  { %529 = vst.msk [vmem:[#allocation3] sm:$0xff] %vm3095_vm2, %v518_v44 }
 0x1fa   :  { %v534_v48 = vld [vmem:[#allocation3 + $0x8] sm:$0xff] }
 0x1fb   :  { %552 = vrot.lane.b32.xlu1 %v534_v48, %s2326_s1  ;;  %v533_v49 = vld [vmem:[#allocation3] sm:$0xff] }
 0x1fc   :  { %550 = vrot.lane.b32.xlu0 %v533_v49, %s2326_s1 }
 0x1ff   :  { %687 = vrot.lane.b32.xlu1 %v68_v34, %s2327_s24 }
 0x200   :  { %685 = vrot.lane.b32.xlu0 %v67_v35, %s2327_s24 }
 0x201   :  { %v301_v50 = vpop.permute.xlu1 %300 }
 0x202   :  { %310 = vst.msk [vmem:[#allocation3 + $0x18] sm:$0xff] %vm3115_vm6, %v301_v50  ;;  %v299_v51 = vpop.permute.xlu0 %298  ;;  %vm693_vm6 = vcmask 785984   ;;  %v892_v50 = vlaneseq }
 0x203   :  { %697 = vrot.lane.b32.xlu1 %v68_v34, %s2328_s25  ;;  %309 = vst.msk [vmem:[#allocation3 + $0x10] sm:$0xff] %vm3116_vm8, %v299_v51  ;;  %vm3118_vm8 = vmmov %vm3117_vm3 }
 0x204   :  { %695 = vrot.lane.b32.xlu0 %v67_v35, %s2328_s25  ;;  %v893_v51 = vshrl.u32 %v892_v50, 7 }
 0x207   :  { %711 = vrot.lane.b32.xlu1 %v2682_v36, %s2325_s0 }
 0x208   :  { %709 = vrot.lane.b32.xlu0 %v1786_v37, %s2325_s0 }
 0x20b   :  { %719 = vrot.lane.b32.xlu1 %v2682_v36, %s2322_s22 }
 0x20c   :  { %717 = vrot.lane.b32.xlu0 %v1786_v37, %s2322_s22 }
 0x20f   :  { %727 = vrot.lane.b32.xlu1 %v2682_v36, %s2327_s24 }
 0x210   :  { %725 = vrot.lane.b32.xlu0 %v1786_v37, %s2327_s24 }
 0x213   :  { %v524_v52 = vpop.permute.xlu1 %523  ;;  %733 = vrot.lane.b32.xlu1 %v1786_v37, %s2328_s25 }
 0x214   :  { %532 = vst.msk [vmem:[#allocation3 + $0x18] sm:$0xff] %vm3095_vm2, %v524_v52  ;;  %v522_v53 = vpop.permute.xlu0 %521  ;;  %v894_v52 = vadd.s32 8, %v893_v51 }
 0x215   :  { %531 = vst.msk [vmem:[#allocation3 + $0x10] sm:$0xff] %vm3095_vm2, %v522_v53  ;;  %vm691_vm2 = vcmask 785985  }
 0x217   :  { %v669_v54 = vpop.permute.xlu1 %668 }
 0x218   :  { %675 = vst.msk [vmem:[#allocation2 + $0x9] sm:$0x7f] %vm674_vm7, %v669_v54  ;;  %v667_v55 = vpop.permute.xlu0 %666  ;;  %v897_v54 = vmul.u32 2, %v893_v51 }
 0x219   :  { %673 = vst.msk [vmem:[#allocation2 + $0x1] sm:$0xff] %vm672_vm9, %v667_v55 }
 0x21a   :  { %v905_v60 = vadd.s32 1, %v897_v54 }
 0x21b   :  { %v536_v56 = vld [vmem:[#allocation3 + $0x18] sm:$0xff]  ;;  %v679_v57 = vpop.permute.xlu1 %678 }
 0x21c   :  { %556 = vrot.lane.b32.xlu1 %v536_v56, %s2326_s1  ;;  %v535_v58 = vld [vmem:[#allocation3 + $0x10] sm:$0xff]  ;;  %684 = vst.msk [vmem:[#allocation2 + $0x8] sm:$0xff] %vm682_vm11, %v679_v57  ;;  %v677_v59 = vpop.permute.xlu0 %676  ;;  %v898_v57 = vmul.u32 2, %v894_v52 }
 0x21d   :  { %554 = vrot.lane.b32.xlu0 %v535_v58, %s2326_s1  ;;  %683 = vst.msk [vmem:[#allocation2] sm:$0xff] %vm682_vm11, %v677_v59  ;;  %v896_v59 = vand.u32 127, %v892_v50  ;;  %v1247_v50 = vld [vmem:[%s3074_s13 + $0x20] sm:$0xff] }
 0x21e   :  { %v906_v61 = vadd.s32 1, %v898_v57 }
 0x221   :  { %735 = vrot.lane.b32.xlu0 %v2682_v36, %s2328_s25  ;;  %v1802_v36 = vld [vmem:[%s3069_s8] ss:$0 sm:$0xff] }
 0x26d   :  { %v553_v62 = vpop.permute.xlu1 %552 }
 0x26e   :  { %v551_v63 = vpop.permute.xlu0 %550 }
 0x26f   :  { %1976 = vmatprep.mubr.msk.f32.mxu1 %vm3117_vm3, %v551_v63  ;;  %vm703_vm3 = vcmask 982784  }
 0x270   :  { %1977 = vmatmul.mubr.msk.f32.vlgmr.msra.gmra.mrb[4].mxu1 %vm3118_vm8, %v553_v62  ;;  %vm701_vm8 = vcmask 982786  }
 0x271   :  { %v688_v3 = vpop.permute.xlu1 %687  ;;  %2145 = vmatpush3.bf16.msra.mxu1 %v2142_v47 }
 0x272   :  { %694 = vst.msk [vmem:[#allocation2 + $0x7] sm:$0xff] %vm693_vm6, %v688_v3  ;;  %v686_v5 = vpop.permute.xlu0 %685  ;;  %2147 = vmatprep.subr.bf16.mxu1 %v2146_v0 }
 0x273   :  { %692 = vst.msk [vmem:[#allocation2 - $0x1] sm:$0xfe] %vm691_vm2, %v686_v5 }
 0x275   :  { %v698_v9 = vpop.permute.xlu1 %697  ;;  %2149 = vmatpush3.bf16.msra.mxu1 %v2146_v0 }
 0x276   :  { %704 = vst.msk [vmem:[#allocation2 + $0x6] sm:$0xff] %vm703_vm3, %v698_v9  ;;  %2151 = vmatprep.subr.bf16.mxu1 %v2150_v6  ;;  %v696_v10 = vpop.permute.xlu0 %695 }
 0x277   :  { %702 = vst.msk [vmem:[#allocation2 - $0x2] sm:$0xfc] %vm701_vm8, %v696_v10 }
 0x279   :  { %v712_v14 = vpop.permute.xlu1 %711  ;;  %2153 = vmatpush3.bf16.msra.mxu1 %v2150_v6 }
 0x27a   :  { %716 = vst.msk [vmem:[#allocation2 + $0x19] sm:$0x7f] %vm674_vm7, %v712_v14  ;;  %2155 = vmatprep.subr.bf16.mxu1 %v2154_v11  ;;  %v710_v15 = vpop.permute.xlu0 %709  ;;  %vm3119_vm7 = vcmask 130048  }
 0x27b   :  { %715 = vst.msk [vmem:[#allocation2 + $0x11] sm:$0xff] %vm672_vm9, %v710_v15  ;;  %vm3120_vm9 = vmmov %vm3119_vm7 }
 0x27d   :  { %v720_v19 = vpop.permute.xlu1 %719  ;;  %2157 = vmatpush3.bf16.msra.mxu1 %v2154_v11  ;;  %v742_v20 = vld [vmem:[#allocation2 + $0x8] sm:$0xff] }
 0x27e   :  { %724 = vst.msk [vmem:[#allocation2 + $0x18] sm:$0xff] %vm682_vm11, %v720_v19  ;;  %2159 = vmatprep.subr.bf16.mxu1 %v2158_v16  ;;  %v718_v21 = vpop.permute.xlu0 %717  ;;  %v741_v23 = vld [vmem:[#allocation2] sm:$0xff]  ;;  %v1119_v19 = vld [vmem:[%s3072_s11 + $0x8] sm:$0xff] }
 0x27f   :  { %1079 = vst.msk [vmem:[#allocation2 + $0x8] sm:$0xff] %vm311_vm10, %v2321_v4  ;;  %1078 = vst.msk [vmem:[#allocation2] sm:$0xff] %vm311_vm10, %v2321_v4 }
 0x280   :  { %723 = vst.msk [vmem:[#allocation2 + $0x10] sm:$0xff] %vm682_vm11, %v718_v21 }
 0x281   :  { %v728_v26 = vpop.permute.xlu1 %727  ;;  %2161 = vmatpush3.bf16.msra.mxu1 %v2158_v16 }
 0x282   :  { %732 = vst.msk [vmem:[#allocation2 + $0x17] sm:$0xff] %vm693_vm6, %v728_v26  ;;  %2163 = vmatprep.subr.bf16.mxu1 %v2162_v22  ;;  %v726_v27 = vpop.permute.xlu0 %725 }
 0x283   :  { %731 = vst.msk [vmem:[#allocation2 + $0xf] sm:$0xfe] %vm691_vm2, %v726_v27  ;;  %vm3121_vm2 = vcmask 64512   ;;  %v1120_v27 = vld [vmem:[%s3072_s11 + $0x10] sm:$0xff] }
 0x284   :  { %vm3122_vm11 = vmmov %vm3121_vm2 }
 0x285   :  { %v734_v29 = vpop.permute.xlu1 %733  ;;  %2165 = vmatpush3.bf16.msra.mxu1 %v2162_v22  ;;  %vm3124_vm6 = vmmov %vm3121_vm2 }
 0x286   :  { %739 = vst.msk [vmem:[#allocation2 + $0xe] sm:$0xfc] %vm701_vm8, %v734_v29  ;;  %2167 = vmatprep.subr.bf16.mxu1 %v2166_v28  ;;  %vm913_vm8 = vcmask 261120  }
 0x289   :  { %2169 = vmatpush3.bf16.msra.mxu1 %v2166_v28  ;;  %v1121_v28 = vld [vmem:[%s3072_s11 + $0x18] sm:$0xff] }
 0x28a   :  { %2010 = vmatprep.subr.mxu1 %v759_v30  ;;  %v2190_v29 = vpack.c.bf16 %v1121_v28, %v1120_v27  ;;  %v1351_v27 = vld [vmem:[%s3076_s15 + $0x8] sm:$0xff] }
 0x28d   :  { %2011 = vmatpush3.msra.mxu1 %v759_v30  ;;  %v1122_v30 = vld [vmem:[%s3072_s11 + $0x20] sm:$0xff]  ;;  %s2330_s11 = smov 104  }
 0x28e   :  { %v557_v32 = vpop.permute.xlu1 %556 }
 0x28f   :  { %v555_v31 = vpop.permute.xlu0 %554 }
 0x290   :  { %1979 = vmatprep.mubr.msk.f32.mxu1 %vm3119_vm7, %v555_v31  ;;  %vm907_vm7 = vcmp.eq.s32.totalorder %v896_v59, %v905_v60  ;;  %v1243_v31 = vld [vmem:[%s3074_s13] sm:$0xff]  ;;  %v1480_v60 = vld [vmem:[%s3078_s17 + $0x10] sm:$0xff] }
 0x291   :  { %1980 = vmatmul.mubr.msk.f32.gmra.mrb[6].mxu1 %vm3120_vm9, %v557_v32  ;;  %vm2807_vm9 = vcmp.eq.s32.totalorder %v896_v59, %v898_v57  ;;  %v2815_v0 = vsel %vm907_vm7, 1.0, %v2321_v4  ;;  %v1244_v32 = vld [vmem:[%s3074_s13 + $0x8] sm:$0xff]  ;;  %vm3136_vm7 = vcmask 654850   ;;  %v1478_v57 = vld [vmem:[%s3078_s17] sm:$0xff] }
 0x292   :  { %2012 = vmatprep.mubr.msk.f32.mxu1 %vm655_vm15, %v741_v23  ;;  %2037 = vmatprep.mubr.msk.f32.mxu0 %vm913_vm8, %v2815_v0  ;;  %v1813_v16 = vsel %vm2807_vm9, 1.0, %v2321_v4 }
 0x293   :  { %v736_v33 = vpop.permute.xlu0 %735 }
 0x294   :  { %740 = vst.msk [vmem:[#allocation2 + $0x16] sm:$0xff] %vm703_vm3, %v736_v33  ;;  %vm899_vm3 = vcmp.eq.s32.totalorder %v896_v59, %v897_v54  ;;  %v2194_v33 = vpack.c.bf16 %v1244_v32, %v1243_v31 }
 0x295   :  { %2013 = vmatmul.mubr.msk.f32.vlgmr.msra.gmra.mrb[8].mxu1 %vm655_vm15, %v742_v20  ;;  %v2812_v63 = vsel %vm899_vm3, 1.0, %v2321_v4  ;;  %v2186_v20 = vpack.c.bf16 %v1119_v19, %v1118_v18 }
 0x29b   :  { %v743_v34 = vld [vmem:[#allocation2 + $0x10] sm:$0xff]  ;;  %v744_v35 = vld [vmem:[#allocation2 + $0x18] sm:$0xff] }
 0x29c   :  { %2015 = vmatprep.mubr.msk.f32.mxu1 %vm655_vm15, %v743_v34 }
 0x29d   :  { %2016 = vmatmul.mubr.msk.f32.gmra.mrb[10].mxu1 %vm655_vm15, %v744_v35  ;;  %vm3123_vm15 = vmmov %vm3121_vm2 }
 0x29e   :  { %2026 = vmatprep.mubr.msk.f32.mxu1 %vm913_vm8, %v2812_v63 }
 0x343   :  { %v1978_v37 = vpop.f32.mrb[4].mxu1 }
 0x344   :  { %v638_v38 = vadd.f32 %v1978_v37, %v1802_v36  ;;  %v632_v39 = vpop.f32.mrb[5].mxu1 }
 0x345   :  { %v633_v40 = vadd.f32 %v1802_v36, %v632_v39 }
 0x346   :  { %652 = vst.msk [vmem:[#allocation3 + $0x8] sm:$0xff] %vm3121_vm2, %v638_v38  ;;  %vm908_vm2 = vcmp.eq.s32.totalorder %v896_v59, %v906_v61  ;;  %v1481_v61 = vld [vmem:[%s3078_s17 + $0x18] sm:$0xff] }
 0x347   :  { %651 = vst.msk [vmem:[#allocation3] sm:$0xff] %vm3122_vm11, %v633_v40  ;;  %v1815_v17 = vsel %vm908_vm2, 1.0, %v2321_v4  ;;  %vm3127_vm11 = vcmask 195712   ;;  %v2210_v62 = vpack.c.bf16 %v1481_v61, %v1480_v60 }
 0x364   :  { %v1981_v41 = vpop.f32.mrb[6].mxu1 }
 0x365   :  { %v648_v42 = vadd.f32 %v1981_v41, %v1802_v36  ;;  %v642_v43 = vpop.f32.mrb[7].mxu1 }
 0x366   :  { %v643_v44 = vadd.f32 %v1802_v36, %v642_v43 }
 0x367   :  { %654 = vst.msk [vmem:[#allocation3 + $0x18] sm:$0xff] %vm3123_vm15, %v648_v42  ;;  %vm3128_vm15 = vmmov %vm3127_vm11 }
 0x368   :  { %653 = vst.msk [vmem:[#allocation3 + $0x10] sm:$0xff] %vm3124_vm6, %v643_v44  ;;  %v2014_v46 = vpop.f32.mrb[8].mxu1  ;;  %v1245_v44 = vld [vmem:[%s3074_s13 + $0x10] sm:$0xff]  ;;  %vm3129_vm6 = vmmov %vm3127_vm11 }
 0x369   :  { %v851_v47 = vadd.f32 %v2014_v46, %v1807_v45  ;;  %v845_v48 = vpop.f32.mrb[9].mxu1  ;;  %vm3130_vm3 = vmmov %vm3129_vm6 }
 0x36a   :  { %v846_v49 = vadd.f32 %v1807_v45, %v845_v48 }
 0x36b   :  { %870 = vrot.lane.b32.xlu1 %v851_v47, %s2324_s2 }
 0x36c   :  { %868 = vrot.lane.b32.xlu0 %v846_v49, %s2324_s2 }
 0x370   :  { %v2017_v53 = vpop.f32.mrb[10].mxu1 }
 0x371   :  { %v861_v55 = vadd.f32 %v2017_v53, %v1807_v45  ;;  %v855_v56 = vpop.f32.mrb[11].mxu1 }
 0x372   :  { %v856_v58 = vadd.f32 %v1807_v45, %v855_v56  ;;  %v1246_v45 = vld [vmem:[%s3074_s13 + $0x18] sm:$0xff] }
 0x373   :  { %874 = vrot.lane.b32.xlu1 %v861_v55, %s2324_s2  ;;  %v2198_v47 = vpack.c.bf16 %v1246_v45, %v1245_v44  ;;  %v1826_v45 = vld [vmem:[%s3077_s16] ss:$0 sm:$0xff]  ;;  %s2333_s16 = smov [#allocation4]  }
 0x374   :  { %872 = vrot.lane.b32.xlu0 %v856_v58, %s2324_s2  ;;  %v1479_v58 = vld [vmem:[%s3078_s17 + $0x8] sm:$0xff] }
 0x375   :  { %v2206_v59 = vpack.c.bf16 %v1479_v58, %v1478_v57 }
 0x3dd   :  { %v871_v1 = vpop.permute.xlu1 %870 }
 0x3de   :  { %881 = vst.msk [vmem:[#allocation3 + $0x8] sm:$0xff] %vm328_vm13, %v871_v1  ;;  %v869_v2 = vpop.permute.xlu0 %868  ;;  %v1820_v1 = vld [vmem:[%s3073_s12] ss:$0 sm:$0xff] }
 0x3df   :  { %880 = vst.msk [vmem:[#allocation3] sm:$0xff] %vm328_vm13, %v869_v2 }
 0x3e5   :  { %v875_v3 = vpop.permute.xlu1 %874  ;;  %v885_v5 = vld [vmem:[#allocation3 + $0x8] sm:$0xff] }
 0x3e6   :  { %883 = vst.msk [vmem:[#allocation3 + $0x18] sm:$0xff] %vm328_vm13, %v875_v3  ;;  %v873_v6 = vpop.permute.xlu0 %872  ;;  %v884_v7 = vld [vmem:[#allocation3] sm:$0xff]  ;;  %v889_v8 = vmax.f32 %v885_v5, 0.0 }
 0x3e7   :  { %882 = vst.msk [vmem:[#allocation3 + $0x10] sm:$0xff] %vm328_vm13, %v873_v6  ;;  %v888_v9 = vmax.f32 %v884_v7, 0.0 }
 0x3e9   :  { %v2170_v10 = vpack.c.bf16 %v889_v8, %v888_v9  ;;  %v1482_v8 = vld [vmem:[%s3078_s17 + $0x20] sm:$0xff]  ;;  %v1483_v9 = vld [vmem:[%s3078_s17 + $0x28] sm:$0xff] }
 0x3eb   :  { %2171 = vmatprep.subr.bf16.mxu1 %v2170_v10  ;;  %2179 = vmatprep.subr.bf16.mxu0 %v2170_v10 }
 0x3ec   :  { %2173 = vmatpush3.bf16.msra.mxu1 %v2170_v10  ;;  %2181 = vmatpush3.bf16.msra.mxu0 %v2170_v10  ;;  %v2214_v10 = vpack.c.bf16 %v1483_v9, %v1482_v8 }
 0x3ed   :  { %v887_v11 = vld [vmem:[#allocation3 + $0x18] sm:$0xff] }
 0x3ee   :  { %v886_v12 = vld [vmem:[#allocation3 + $0x10] sm:$0xff]  ;;  %v891_v13 = vmax.f32 %v887_v11, 0.0 }
 0x3ef   :  { %v890_v14 = vmax.f32 %v886_v12, 0.0  ;;  %v1484_v12 = vld [vmem:[%s3078_s17 + $0x30] sm:$0xff] }
 0x3f1   :  { %v2174_v15 = vpack.c.bf16 %v891_v13, %v890_v14  ;;  %v1485_v13 = vld [vmem:[%s3078_s17 + $0x38] sm:$0xff] }
 0x3f2   :  { %v2218_v14 = vpack.c.bf16 %v1485_v13, %v1484_v12 }
 0x3f3   :  { %2175 = vmatprep.subr.bf16.mxu1 %v2174_v15  ;;  %2183 = vmatprep.subr.bf16.mxu0 %v2174_v15 }
 0x3f4   :  { %2177 = vmatpush3.bf16.msra.mxu1 %v2174_v15  ;;  %2185 = vmatpush3.bf16.msra.mxu0 %v2174_v15  ;;  %v1823_v15 = vld [vmem:[%s3075_s14] ss:$0 sm:$0xff] }
 0x3f5   :  { %2187 = vmatprep.subr.bf16.mxu0 %v2186_v20 }
 0x3f7   :  { %2027 = vmatmul.mubr.msk.f32.vlgmr.msra.gmra.mrb[12].mxu1 %vm913_vm8, %v1813_v16  ;;  %2038 = vmatmul.mubr.msk.f32.vlgmr.msra.gmra.mrb[4].mxu0 %vm913_vm8, %v1815_v17  ;;  %v1486_v16 = vld [vmem:[%s3078_s17 + $0x40] sm:$0xff]  ;;  %v1487_v17 = vld [vmem:[%s3078_s17 + $0x48] sm:$0xff] }
 0x3f8   :  { %2189 = vmatpush3.bf16.msra.mxu0 %v2186_v20  ;;  %v2222_v18 = vpack.c.bf16 %v1487_v17, %v1486_v16 }
 0x3f9   :  { %2191 = vmatprep.subr.bf16.mxu0 %v2190_v29 }
 0x3fc   :  { %2193 = vmatpush3.bf16.msra.mxu0 %v2190_v29 }
 0x3fd   :  { %2048 = vmatprep.subr.mxu0 %v1122_v30 }
 0x400   :  { %2049 = vmatpush3.msra.mxu0 %v1122_v30 }
 0x401   :  { %2195 = vmatprep.subr.bf16.mxu0 %v2194_v33 }
 0x4ca   :  { %v2028_v21 = vpop.f32.mrb[12].mxu1  ;;  %v2039_v22 = vpop.f32.mrb[4].mxu0 }
 0x4cb   :  { %v2838_v23 = vmax.f32 %v2028_v21, %v2039_v22  ;;  %v986_v24 = vpop.f32.mrb[13].mxu1  ;;  %v1067_v25 = vpop.f32.mrb[5].mxu0 }
 0x4cc   :  { %v2840_v26 = vmax.f32 %v986_v24, %v1067_v25 }
 0x4cd   :  { %1103 = vrot.lane.b32.xlu1 %v2838_v23, %s2329_s4  ;;  %1099 = vrot.lane.b32.xlu0 %v2838_v23, %s2326_s1 }
 0x4d1   :  { %1085 = vrot.lane.b32.xlu1 %v2840_v26, %s2329_s4  ;;  %1081 = vrot.lane.b32.xlu0 %v2840_v26, %s2326_s1 }
 0x4d5   :  { %1094 = vrot.lane.b32.xlu1 %v2840_v26, %s2320_s3  ;;  %1090 = vrot.lane.b32.xlu0 %v2840_v26, %s2324_s2 }
 0x4d9   :  { %1112 = vrot.lane.b32.xlu1 %v2838_v23, %s2320_s3  ;;  %1108 = vrot.lane.b32.xlu0 %v2838_v23, %s2324_s2 }
 0x4dd   :  { %1233 = vrot.lane.b32.xlu1 %v2838_v23, %s2330_s11  ;;  %1225 = vrot.lane.b32.xlu0 %v2840_v26, %s2330_s11 }
 0x4e1   :  { %1464 = vrot.lane.b32.xlu1 %v2838_v23, %s2319_s27  ;;  %1454 = vrot.lane.b32.xlu0 %v2840_v26, %s2322_s22 }
 0x4e5   :  { %1450 = vrot.lane.b32.xlu1 %v2840_v26, %s2319_s27 }
 0x4e9   :  { %1458 = vrot.lane.b32.xlu1 %v2840_v26, %s2323_s30 }
 0x53f   :  { %v1104_v34 = vpop.permute.xlu1 %1103  ;;  %v1100_v35 = vpop.permute.xlu0 %1099 }
 0x540   :  { %1102 = vst.msk [vmem:[#allocation2 + $0xa] sm:$0x3f] %vm318_vm12, %v1100_v35 }
 0x541   :  { %1106 = vst.msk [vmem:[#allocation2 + $0x9] sm:$0x7f] %vm330_vm14, %v1104_v34 }
 0x542   :  { %1107 = vst.msk [vmem:[#allocation2 + $0x8] sm:$0xff] %vm3127_vm11, %v2838_v23 }
 0x543   :  { %v1086_v36 = vpop.permute.xlu1 %1085  ;;  %v1082_v37 = vpop.permute.xlu0 %1081 }
 0x544   :  { %1084 = vst.msk [vmem:[#allocation2 + $0x2] sm:$0x3f] %vm318_vm12, %v1082_v37 }
 0x545   :  { %1088 = vst.msk [vmem:[#allocation2 + $0x1] sm:$0x7f] %vm330_vm14, %v1086_v36 }
 0x546   :  { %1089 = vst.msk [vmem:[#allocation2] sm:$0xff] %vm3128_vm15, %v2840_v26  ;;  %vm3143_vm15 = vmmov %vm3136_vm7 }
 0x547   :  { %v1095_v38 = vpop.permute.xlu1 %1094  ;;  %v1091_v39 = vpop.permute.xlu0 %1090 }
 0x548   :  { %1093 = vst.msk [vmem:[#allocation2 - $0x1] sm:$0xfe] %vm346_vm1, %v1091_v39 }
 0x549   :  { %1097 = vst.msk [vmem:[#allocation2 - $0x2] sm:$0xfc] %vm356_vm0, %v1095_v38 }
 0x54b   :  { %v1113_v40 = vpop.permute.xlu1 %1112  ;;  %v1109_v41 = vpop.permute.xlu0 %1108 }
 0x54c   :  { %1111 = vst.msk [vmem:[#allocation2 + $0x7] sm:$0xfe] %vm346_vm1, %v1109_v41 }
 0x54d   :  { %1115 = vst.msk [vmem:[#allocation2 + $0x6] sm:$0xfc] %vm356_vm0, %v1113_v40 }
 0x54f   :  { %v1234_v42 = vpop.permute.xlu1 %1233  ;;  %v1226_v46 = vpop.permute.xlu0 %1225 }
 0x550   :  { %v1116_v43 = vld [vmem:[#allocation2] sm:$0xff] }
 0x551   :  { %1223 = vst.msk [vmem:[#allocation2] sm:$0xff] %vm311_vm10, %v2321_v4  ;;  %2050 = vmatprep.mubr.msk.f32.mxu0 %vm311_vm10, %v1116_v43 }
 0x552   :  { %1228 = vst.msk [vmem:[#allocation2 + $0x2] sm:$0x3f] %vm318_vm12, %v1226_v46 }
 0x553   :  { %1229 = vst.msk [vmem:[#allocation2 + $0x1] sm:$0x7f] %vm330_vm14, %v1082_v37  ;;  %v1465_v49 = vpop.permute.xlu1 %1464  ;;  %v1455_v54 = vpop.permute.xlu0 %1454 }
 0x554   :  { %v1117_v48 = vld [vmem:[#allocation2 + $0x8] sm:$0xff]  ;;  %1230 = vst.msk [vmem:[#allocation2] sm:$0xff] %vm3129_vm6, %v1086_v36 }
 0x555   :  { %1224 = vst.msk [vmem:[#allocation2 + $0x8] sm:$0xff] %vm311_vm10, %v2321_v4  ;;  %2051 = vmatmul.mubr.msk.f32.vlgmr.msra.gmra.mrb[6].mxu0 %vm311_vm10, %v1117_v48 }
 0x556   :  { %1231 = vst.msk [vmem:[#allocation2 - $0x1] sm:$0xfe] %vm346_vm1, %v2840_v26  ;;  %2197 = vmatpush3.bf16.msra.mxu0 %v2194_v33 }
 0x557   :  { %1236 = vst.msk [vmem:[#allocation2 + $0xa] sm:$0x3f] %vm318_vm12, %v1234_v42  ;;  %2199 = vmatprep.subr.bf16.mxu0 %v2198_v47  ;;  %v1451_v51 = vpop.permute.xlu1 %1450  ;;  %vm3131_vm12 = vcmask 654336  }
 0x558   :  { %1232 = vst.msk [vmem:[#allocation2 - $0x2] sm:$0xfc] %vm356_vm0, %v1091_v39  ;;  %v2331_v39 = vmov 0.0|0.0  }
 0x559   :  { %1237 = vst.msk [vmem:[#allocation2 + $0x9] sm:$0x7f] %vm330_vm14, %v1100_v35  ;;  %vm3132_vm14 = vcmask 128000  }
 0x55a   :  { %1238 = vst.msk [vmem:[#allocation2 + $0x8] sm:$0xff] %vm3130_vm3, %v1104_v34  ;;  %2201 = vmatpush3.bf16.msra.mxu0 %v2198_v47  ;;  %vm3135_vm8 = vmmov %vm3132_vm14 }
 0x55b   :  { %1239 = vst.msk [vmem:[#allocation2 + $0x7] sm:$0xfe] %vm346_vm1, %v2838_v23  ;;  %2061 = vmatprep.subr.mxu0 %v1247_v50  ;;  %vm3134_vm1 = vcmask 523649   ;;  %v1459_v55 = vpop.permute.xlu1 %1458 }
 0x55c   :  { %1240 = vst.msk [vmem:[#allocation2 + $0x6] sm:$0xfc] %vm356_vm0, %v1109_v41  ;;  %vm3133_vm0 = vmmov %vm3131_vm12 }
 0x55d   :  { %vm3137_vm9 = vmmov %vm3133_vm0 }
 0x55e   :  { %2062 = vmatpush3.msra.mxu0 %v1247_v50  ;;  %vm3142_vm11 = vmmov %vm3134_vm1 }
 0x55f   :  { %v1241_v52 = vld [vmem:[#allocation2] sm:$0xff]  ;;  %2207 = vmatprep.subr.bf16.mxu0 %v2206_v59  ;;  %vm3144_vm6 = vmmov %vm3133_vm0 }
 0x560   :  { %1446 = vst.msk [vmem:[#allocation2] sm:$0xff] %vm3131_vm12, %v2321_v4  ;;  %2063 = vmatprep.mubr.msk.f32.mxu0 %vm311_vm10, %v1241_v52 }
 0x561   :  { %1448 = vst.msk [vmem:[#allocation2 + $0x2] sm:$0x3f] %vm3132_vm14, %v2840_v26  ;;  %v1350_v26 = vld [vmem:[%s3076_s15] sm:$0xff]  ;;  %vm2332_vm14 = vmmov 0  }
 0x562   :  { %1449 = vst.msk [vmem:[#allocation2 + $0x1] sm:$0x7f] %vm101_vm5, %v1095_v38  ;;  %v2202_v28 = vpack.c.bf16 %v1351_v27, %v1350_v26 }
 0x563   :  { %v1242_v53 = vld [vmem:[#allocation2 + $0x8] sm:$0xff]  ;;  %1453 = vst.msk [vmem:[#allocation2] sm:$0xff] %vm109_vm4, %v1451_v51 }
 0x564   :  { %1447 = vst.msk [vmem:[#allocation2 + $0x8] sm:$0xff] %vm3133_vm0, %v2321_v4  ;;  %2064 = vmatmul.mubr.msk.f32.vlgmr.msra.gmra.mrb[8].mxu0 %vm311_vm10, %v1242_v53  ;;  %2203 = vmatprep.subr.bf16.mxu1 %v2202_v28  ;;  %vm3140_vm10 = vcmask 261312   ;;  %vm3147_vm0 = vcmask 64512  }
 0x565   :  { %1457 = vst.msk [vmem:[#allocation2 - $0x1] sm:$0xfe] %vm3134_vm1, %v1455_v54  ;;  %2209 = vmatpush3.bf16.msra.mxu0 %v2206_v59  ;;  %2205 = vmatpush3.bf16.msra.mxu1 %v2202_v28  ;;  %vm3141_vm2 = vmmov %vm3140_vm10 }
 0x566   :  { %1462 = vst.msk [vmem:[#allocation2 + $0xa] sm:$0x3f] %vm3135_vm8, %v2838_v23  ;;  %2211 = vmatprep.subr.bf16.mxu0 %v2210_v62  ;;  %2226 = vmatprep.subr.bf16.mxu1 %v2331_v39  ;;  %vm3148_vm1 = vmmov %vm3147_vm0 }
 0x567   :  { %1461 = vst.msk [vmem:[#allocation2 - $0x2] sm:$0xfc] %vm3136_vm7, %v1459_v55 }
 0x568   :  { %1463 = vst.msk [vmem:[#allocation2 + $0x9] sm:$0x7f] %vm101_vm5, %v1113_v40  ;;  %vm3139_vm5 = vmmov %vm3130_vm3  ;;  %v1829_v40 = vld [vmem:[%s3079_s18] ss:$0 sm:$0xff]  ;;  %s1751_s18 = sshll.u32 %s2333_s16, 4  ;;  %s1752_s18 = int_to_ptr.vmem [resolvable:$true] %s1751_s18 }
 0x569   :  { %1467 = vst.msk [vmem:[#allocation2 + $0x8] sm:$0xff] %vm109_vm4, %v1465_v49  ;;  %2213 = vmatpush3.bf16.msra.mxu0 %v2210_v62  ;;  %vm3138_vm4 = vmmov %vm3130_vm3  ;;  %vm3145_vm3 = vcmask 130048   ;;  %p2254_p1 = scmp.lt.s32.totalorder %s1752_s18, %s1752_s18 }
 0x56a   :  { %2215 = vmatprep.subr.bf16.mxu0 %v2214_v10  ;;  %vm3146_vm12 = vmmov %vm3145_vm3 }
 0x56b   :  { %vm3149_vm8 = vmmov %vm3145_vm3 }
 0x56c   :  { %vm3150_vm7 = vmmov %vm3145_vm3 }
 0x56d   :  { %2217 = vmatpush3.bf16.msra.mxu0 %v2214_v10 }
 0x56e   :  { %v1476_v56 = vld [vmem:[#allocation2] sm:$0xff]  ;;  %2219 = vmatprep.subr.bf16.mxu0 %v2218_v14 }
 0x56f   :  { %2093 = vmatprep.mubr.msk.f32.mxu0 %vm3137_vm9, %v1476_v56 }
 0x571   :  { %2221 = vmatpush3.bf16.msra.mxu0 %v2218_v14 }
 0x572   :  { %2223 = vmatprep.subr.bf16.mxu0 %v2222_v18 }
 0x575   :  { %2225 = vmatpush3.bf16.msra.mxu0 %v2222_v18 }
 0x628   :  { %v2052_v2 = vpop.f32.mrb[6].mxu0 }
 0x629   :  { %v1208_v3 = vadd.f32 %v2052_v2, %v1820_v1  ;;  %v1202_v5 = vpop.f32.mrb[7].mxu0 }
 0x62a   :  { %v1203_v7 = vadd.f32 %v1820_v1, %v1202_v5 }
 0x62b   :  { %v1212_v6 = vmax.f32 %v1208_v3, 0.0 }
 0x62c   :  { %v1211_v11 = vmax.f32 %v1203_v7, 0.0 }
 0x62d   :  { %1217 = vrot.lane.b32.xlu0 %v1212_v6, %s2320_s3 }
 0x631   :  { %1215 = vrot.lane.b32.xlu0 %v1211_v11, %s2320_s3 }
 0x637   :  { %v2065_v19 = vpop.f32.mrb[8].mxu0 }
 0x638   :  { %v1333_v20 = vadd.f32 %v2065_v19, %v1823_v15  ;;  %v1327_v21 = vpop.f32.mrb[9].mxu0 }
 0x639   :  { %v1328_v22 = vadd.f32 %v1823_v15, %v1327_v21 }
 0x63a   :  { %v1337_v24 = vmax.f32 %v1333_v20, 0.0 }
 0x63b   :  { %v1336_v25 = vmax.f32 %v1328_v22, 0.0 }
 0x63c   :  { %1342 = vrot.lane.b32.xlu0 %v1337_v24, %s2325_s0 }
 0x63d   :  { %1340 = vrot.lane.b32.xlu1 %v1336_v25, %s2325_s0 }
 0x640   :  { %1468 = vrot.lane.b32.xlu0 %v2838_v23, %s2322_s22 }
 0x641   :  { %1472 = vrot.lane.b32.xlu1 %v2838_v23, %s2323_s30 }
 0x69f   :  { %v1218_v29 = vpop.permute.xlu0 %1217 }
 0x6a0   :  { %1222 = vst.msk [vmem:[#allocation3 + $0x8] sm:$0xff] %vm3138_vm4, %v1218_v29 }
 0x6a3   :  { %v1216_v30 = vpop.permute.xlu0 %1215 }
 0x6a4   :  { %1221 = vst.msk [vmem:[#allocation3] sm:$0xff] %vm3139_vm5, %v1216_v30 }
 0x6ae   :  { %v1343_v31 = vpop.permute.xlu0 %1342 }
 0x6af   :  { %1347 = vst.msk [vmem:[#allocation3 + $0x8] sm:$0xff] %vm3140_vm10, %v1343_v31  ;;  %v1341_v32 = vpop.permute.xlu1 %1340 }
 0x6b0   :  { %1346 = vst.msk [vmem:[#allocation3] sm:$0xff] %vm3141_vm2, %v1341_v32 }
 0x6b2   :  { %v1469_v33 = vpop.permute.xlu0 %1468 }
 0x6b3   :  { %1471 = vst.msk [vmem:[#allocation2 + $0x7] sm:$0xfe] %vm3142_vm11, %v1469_v33  ;;  %v1473_v34 = vpop.permute.xlu1 %1472 }
 0x6b4   :  { %1475 = vst.msk [vmem:[#allocation2 + $0x6] sm:$0xfc] %vm3143_vm15, %v1473_v34 }
 0x6b6   :  { %v1349_v35 = vld [vmem:[#allocation3 + $0x8] sm:$0xff] }
 0x6b7   :  { %1363 = vrot.lane.b32.xlu1 %v1349_v35, %s2326_s1  ;;  %v1348_v23 = vld [vmem:[#allocation3] sm:$0xff] }
 0x6b8   :  { %1361 = vrot.lane.b32.xlu0 %v1348_v23, %s2326_s1 }
 0x6bb   :  { %v1477_v36 = vld [vmem:[#allocation2 + $0x8] sm:$0xff] }
 0x6bc   :  { %2094 = vmatmul.mubr.msk.f32.vlgmr.msra.gmra.mrb[10].mxu0 %vm3144_vm6, %v1477_v36 }
 0x729   :  { %v1364_v38 = vpop.permute.xlu1 %1363 }
 0x72a   :  { %v1362_v37 = vpop.permute.xlu0 %1361 }
 0x72b   :  { %2070 = vmatprep.mubr.msk.f32.mxu1 %vm3145_vm3, %v1362_v37 }
 0x72c   :  { %2071 = vmatmul.mubr.msk.f32.vlgmr.msra.gmra.mrb[14].mxu1 %vm3146_vm12, %v1364_v38 }
 0x72d   :  { %2100 = vmatprep.mubr.msk.f32.mxu1 %vm2332_vm14, %v2321_v4 }
 0x78f   :  { %v2095_v41 = vpop.f32.mrb[10].mxu0 }
 0x790   :  { %v1573_v42 = vadd.f32 %v2095_v41, %v1829_v40  ;;  %v1567_v43 = vpop.f32.mrb[11].mxu0 }
 0x791   :  { %v1568_v44 = vadd.f32 %v1829_v40, %v1567_v43 }
 0x792   :  { %1580 = vrot.lane.b32.xlu1 %v1573_v42, %s2324_s2 }
 0x793   :  { %1578 = vrot.lane.b32.xlu0 %v1568_v44, %s2324_s2  ;;  %s2249_s2 = scalar_lea.vmem %s1752_s18, 128 }
 0x794   :  { %p2250_p0 = scmp.ne.s32.totalorder %s1752_s18, %s2249_s2  ;;  %p2255_p2 = scmp.lt.s32.totalorder %s2249_s2, %s2249_s2 }
 0x796   :  { %p2256_p3 = por %p2255_p2, %p2254_p1 }
 0x798   :  { %p2257_p4 = pnand %p2256_p3, %p2250_p0 }
 0x7ff   :  { %v2072_v46 = vpop.f32.mrb[14].mxu1 }
 0x800   :  { %v1441_v47 = vadd.f32 %v2072_v46, %v1826_v45  ;;  %v1435_v48 = vpop.f32.mrb[15].mxu1 }
 0x801   :  { %v1436_v49 = vadd.f32 %v1826_v45, %v1435_v48 }
 0x802   :  { %1445 = vst.msk [vmem:[#allocation3 + $0x8] sm:$0xff] %vm3147_vm0, %v1441_v47 }
 0x803   :  { %1444 = vst.msk [vmem:[#allocation3] sm:$0xff] %vm3148_vm1, %v1436_v49 }
 0x804   :  { %v1581_v50 = vpop.permute.xlu1 %1580 }
 0x805   :  { %1585 = vst.msk [vmem:[#allocation3 + $0x8] sm:$0xff] %vm328_vm13, %v1581_v50  ;;  %v1579_v51 = vpop.permute.xlu0 %1578 }
 0x806   :  { %1584 = vst.msk [vmem:[#allocation3] sm:$0xff] %vm328_vm13, %v1579_v51  ;;  %vm3151_vm13 = vmmov %vm3145_vm3 }
 0x80c   :  { %v1587_v52 = vld [vmem:[#allocation3 + $0x8] sm:$0xff] }
 0x80d   :  { %v1586_v53 = vld [vmem:[#allocation3] sm:$0xff]  ;;  %v1589_v54 = vmax.f32 %v1587_v52, 0.0 }
 0x80e   :  { %v1588_v55 = vmax.f32 %v1586_v53, 0.0 }
 0x810   :  { %v2227_v56 = vpack.c.bf16 %v1589_v54, %v1588_v55 }
 0x812   :  { %2228 = vmatpush3.bf16.msra.mxu1 %v2227_v56 }
 0x813   :  { %2229 = vmatprep.subr.bf16.mxu1 %v2331_v39 }
 0x815   :  { %2101 = vmatmul.mubr.msk.f32.vlgmr.msra.gmra.mrb[16].mxu1 %vm3149_vm8, %v2812_v63 }
 0x816   :  { %2231 = vmatpush3.bf16.msra.mxu1 %v2227_v56  ;;  %2107 = vmatprep.mubr.msk.f32.mxu1 %vm2332_vm14, %v2321_v4 }
 0x819   :  { %2108 = vmatmul.mubr.msk.f32.vlgmr.msra.gmra.mrb[18].mxu1 %vm3150_vm7, %v2815_v0 }
 0x8e8   :  { %v1658_v57 = vpop.f32.mrb[16].mxu1 }
 0x8e9   :  { %v2102_v58 = vpop.f32.mrb[17].mxu1 }
 0x8ec   :  { %v1730_v59 = vpop.f32.mrb[18].mxu1 }
 0x8ed   :  { %v1734_v60 = vmax.f32 %v1658_v57, %v1730_v59  ;;  %v2109_v61 = vpop.f32.mrb[19].mxu1 }
 0x8ef   :  { %1735 = vst.msk [vmem:[#allocation4] sm:$0xff] %vm3151_vm13, %v1734_v60  ;;  %1741 = vrot.lane.b32.xlu1 %v1734_v60, %s2330_s11  ;;  %1737 = vrot.lane.b32.xlu0 %v1734_v60, %s2326_s1 }
 0x8f0   :  { %2260 = shalt.err (!%p2257_p4)
}
 0x8f1   :  { %s2261_s26 = scalar_lea.hbm %s3080_s19, 128 }
 0x8f2   :  { %p2262_p5 = scmp.ne.s32.totalorder %s3080_s19, %s2261_s26  ;;  %p2265_p6 = scmp.lt.u32.totalorder %s2261_s26, %s3080_s19 }
 0x8f4   :  { %p2267_p7 = pnand %p2265_p6, %p2262_p5 }
 0x8f6   :  { %2270 = shalt.err (!%p2267_p7)
}
 0x8f7   :  { %1754 = dma.vmem_to_hbm [thread:$0]  %s1752_s18, 128, %s3080_s19, [#allocation5]   ;;  %vm3152_vm9 = vmmov %vm3147_vm0 }
 0x8f8   :  { %s2334_s13 = smov [#allocation6]   ;;  %s2335_s4 = smov [#allocation8]   ;;  %vm3153_vm4 = vmmov %vm3147_vm0 }
 0x8f9   :  { %s1761_s7 = sshll.u32 %s2334_s13, 4  ;;  %s1771_s9 = sshll.u32 %s2335_s4, 4  ;;  %s1762_s7 = int_to_ptr.vmem [resolvable:$true] %s1761_s7  ;;  %s1772_s9 = int_to_ptr.vmem [resolvable:$true] %s1771_s9 }
 0x8fa   :  { %s2271_s23 = scalar_lea.vmem %s1762_s7, 128  ;;  %p2276_p9 = scmp.lt.s32.totalorder %s1762_s7, %s1762_s7 }
 0x8fb   :  { %p2272_p8 = scmp.ne.s32.totalorder %s1762_s7, %s2271_s23  ;;  %p2277_p10 = scmp.lt.s32.totalorder %s2271_s23, %s2271_s23 }
 0x8fd   :  { %p2278_p11 = por %p2277_p10, %p2276_p9 }
 0x8ff   :  { %p2279_p12 = pnand %p2278_p11, %p2272_p8 }
 0x961   :  { %v1742_v4 = vpop.permute.xlu1 %1741  ;;  %v1738_v63 = vpop.permute.xlu0 %1737 }
 0x962   :  { %1744 = vst.msk [vmem:[#allocation8] sm:$0xff] %vm3152_vm9, %v1742_v4 }
 0x963   :  { %1740 = vst.msk [vmem:[#allocation6] sm:$0xff] %vm3153_vm4, %v1738_v63 }
 0x964   :  { %2282 = shalt.err (!%p2279_p12)
}
 0x965   :  { %s2283_s24 = scalar_lea.hbm %s3081_s20, 128 }
 0x966   :  { %p2284_p13 = scmp.ne.s32.totalorder %s3081_s20, %s2283_s24  ;;  %p2287_p0 = scmp.lt.u32.totalorder %s2283_s24, %s3081_s20 }
 0x968   :  { %p2289_p1 = pnand %p2287_p0, %p2284_p13 }
 0x96a   :  { %2292 = shalt.err (!%p2289_p1)
}
 0x96b   :  { %1764 = dma.vmem_to_hbm [thread:$0]  %s1762_s7, 128, %s3081_s20, [#allocation7]  }
 0x96c   :  { %s2293_s17 = scalar_lea.vmem %s1772_s9, 128  ;;  %p2298_p3 = scmp.lt.s32.totalorder %s1772_s9, %s1772_s9 }
 0x96d   :  { %p2294_p2 = scmp.ne.s32.totalorder %s1772_s9, %s2293_s17  ;;  %p2299_p4 = scmp.lt.s32.totalorder %s2293_s17, %s2293_s17 }
 0x96f   :  { %p2300_p5 = por %p2299_p4, %p2298_p3 }
 0x971   :  { %p2301_p6 = pnand %p2300_p5, %p2294_p2 }
 0x973   :  { %2304 = shalt.err (!%p2301_p6)
}
 0x974   :  { %s2305_s16 = scalar_lea.hbm %s3082_s21, 128 }
 0x975   :  { %p2306_p7 = scmp.ne.s32.totalorder %s3082_s21, %s2305_s16  ;;  %p2309_p8 = scmp.lt.u32.totalorder %s2305_s16, %s3082_s21 }
 0x977   :  { %p2311_p9 = pnand %p2309_p8, %p2306_p7 }
 0x979   :  { %2314 = shalt.err (!%p2311_p9)
}
 0x97a   :  { %1774 = dma.vmem_to_hbm [thread:$0]  %s1772_s9, 128, %s3082_s21, [#allocation7]  }
 0x97b   :  { %2315 = dma.done.wait [#allocation5], 128  }
 0x97c   :  { %2316 = vsyncadd [#allocation5], 4294967168 }
 0x97d   :  { %2317 = dma.done.wait [#allocation7], 256  }
 0x97e   :  { %2318 = vsyncadd [#allocation7], 4294967040 }
 0x97f   :  { %1784 = vsyncpa [#allocation5], 1 }
 0x980   :  { %1785 = vsyncpa [#allocation7], 1 }

</bundles_post_ra>
